<compile_context>
chip_gen: v5e
topology: v5e:2x2
jax: 0.10.0
libtpu: 0.0.40
codegen_flags: <defaults>
</compile_context>

<pallas_src>
import functools

import jax
import jax.numpy as jnp
from jax.experimental import pallas as pl
from jax.experimental.pallas import tpu as pltpu


def _round_up(x: int, m: int) -> int:
    return (x + m - 1) // m * m


def _worldmodel_kernel(
    state_ref,    # [B, SP]  f32 flattened state for step t (lane-padded)
    act_ref,      # [B, HP]  f32 action, placed at lanes [H, H+A), zeros elsewhere
    h0_ref,       # [B, HP]  f32 initial hidden (lane-padded)
    c0_ref,       # [B, HP]  f32 initial cell (lane-padded)
    w_cat_ref,    # [KP, 4*HP] bf16 fused (state | hidden | action) gate weights
    b_ref,        # [1, 4*HP] f32 fused gate bias (b_ih + b_hh, padded)
    w_dec_ref,    # [HP, OP] bf16 decoder weights (transposed, padded)
    b_dec_ref,    # [1, OP]  f32 decoder bias (padded)
    y_ref,        # [B, OP]  f32 next-state prediction for step t (padded)
    h_out_ref,    # [B, HP]  f32 hidden carry / final hidden (resident across grid)
    c_out_ref,    # [B, HP]  f32 cell carry / final cell (resident across grid)
    x_cat_ref,    # scratch [B, KP] bf16 fused input slab
    *,
    s_pad, h_pad,
):
    SP, HP = s_pad, h_pad
    t = pl.program_id(0)

    # h/c are carried in the (same-block-index) output buffers across the
    # "arbitrary" T axis; initialize them from the user-provided state at t==0.
    @pl.when(t == 0)
    def _():
        h_out_ref[...] = h0_ref[...]
        c_out_ref[...] = c0_ref[...]

    # --- Assemble [state | hidden+action] into one lane-dense bf16 slab.
    # Padded lanes of h stay exactly 0 across steps (see epilogue), and the
    # action block is zero on the hidden lanes, so the pack is a single add.
    x_cat_ref[:, 0:SP] = state_ref[...].astype(jnp.bfloat16)
    x_cat_ref[:, SP:SP + HP] = (h_out_ref[...] + act_ref[...]).astype(jnp.bfloat16)

    # --- Single fused gate matmul: bf16 operands, f32 accumulation on the MXU.
    gates = (
        jnp.dot(x_cat_ref[...], w_cat_ref[...], preferred_element_type=jnp.float32)
        + b_ref[...]
    )  # [B, 4*HP]; each gate occupies a lane-aligned 128-wide block.

    i_g = jax.nn.sigmoid(gates[:, 0 * HP:1 * HP])
    f_g = jax.nn.sigmoid(gates[:, 1 * HP:2 * HP])
    g_g = jnp.tanh(gates[:, 2 * HP:3 * HP])
    o_g = jax.nn.sigmoid(gates[:, 3 * HP:4 * HP])

    # f32 elementwise LSTM update.  Padded lanes: gates are 0 there (zero
    # weights + zero bias) -> sigmoid=0.5, tanh=0; with c_pad starting at 0,
    # c_pad stays 0 and h_pad = 0.5*tanh(0) = 0, preserving the invariant.
    c_prev = c_out_ref[...]
    c_new = f_g * c_prev + i_g * g_g
    h_new = o_g * jnp.tanh(c_new)

    c_out_ref[...] = c_new
    h_out_ref[...] = h_new

    # --- Decoder: y = h_new @ W_dec^T + b_dec (padded rows of W_dec are zero).
    y_ref[...] = (
        jnp.dot(h_new.astype(jnp.bfloat16), w_dec_ref[...],
                preferred_element_type=jnp.float32)
        + b_dec_ref[...]
    ).astype(y_ref.dtype)


def worldmodel_rollout(states, actions, hidden, kparams):
    """Multi-step rollout: in-kernel T loop, weights resident in VMEM.

    Args:
      states:  [T, B, ...] float32 (per-step observation, flattened internally)
      actions: [T, B, action_size] float32
      hidden:  tuple (h, c), each [1, B, hidden_size] float32
      kparams: output of prepare_kernel_params().
    Returns:
      (preds [T, B, output_size], (h_T [1,B,H], c_T [1,B,H]))
    """
    dims = kparams["dims"]
    H, A, O = dims["hidden_size"], dims["action_size"], dims["output_size"]
    SP, HP, KP, OP = dims["s_pad"], dims["h_pad"], dims["k_pad"], dims["o_pad"]
    state_size = dims["state_size"]

    T, B = states.shape[0], states.shape[1]
    states_flat = states.reshape(T, B, state_size)
    if SP != state_size:
        states_flat = jnp.pad(states_flat, ((0, 0), (0, 0), (0, SP - state_size)))
    # Action placed at lanes [H, H+A) of the shared 128-lane (hidden|action) block.
    act_pad = jnp.pad(actions.reshape(T, B, A),
                      ((0, 0), (0, 0), (H, HP - H - A)))
    h0 = jnp.pad(hidden[0].reshape(B, H), ((0, 0), (0, HP - H)))
    c0 = jnp.pad(hidden[1].reshape(B, H), ((0, 0), (0, HP - H)))

    kernel = functools.partial(_worldmodel_kernel, s_pad=SP, h_pad=HP)

    y_seq, h_out, c_out = pl.pallas_call(
        kernel,
        out_shape=(
            jax.ShapeDtypeStruct((T, B, OP), jnp.float32),
            jax.ShapeDtypeStruct((B, HP), jnp.float32),
            jax.ShapeDtypeStruct((B, HP), jnp.float32),
        ),
        grid=(T,),
        in_specs=[
            pl.BlockSpec((None, B, SP), lambda t: (t, 0, 0)),   # state, per-step
            pl.BlockSpec((None, B, HP), lambda t: (t, 0, 0)),   # action, per-step
            pl.BlockSpec((B, HP), lambda t: (0, 0)),            # h0 (fetched once)
            pl.BlockSpec((B, HP), lambda t: (0, 0)),            # c0 (fetched once)
            pl.BlockSpec((KP, 4 * HP), lambda t: (0, 0)),       # w_cat, resident
            pl.BlockSpec((1, 4 * HP), lambda t: (0, 0)),        # b_cat, resident
            pl.BlockSpec((HP, OP), lambda t: (0, 0)),           # w_dec, resident
            pl.BlockSpec((1, OP), lambda t: (0, 0)),            # b_dec, resident
        ],
        out_specs=(
            pl.BlockSpec((None, B, OP), lambda t: (t, 0, 0)),   # per-step prediction
            pl.BlockSpec((B, HP), lambda t: (0, 0)),            # h carry/final
            pl.BlockSpec((B, HP), lambda t: (0, 0)),            # c carry/final
        ),
        scratch_shapes=[
            pltpu.VMEM((B, KP), jnp.bfloat16),                  # fused input slab
        ],
        compiler_params=pltpu.CompilerParams(
            dimension_semantics=("arbitrary",)),
    )(
        states_flat, act_pad, h0, c0,
        kparams["w_cat"], kparams["b_cat"], kparams["w_dec"], kparams["b_dec"],
    )

    preds = y_seq[:, :, :O]
    h_T = h_out[:, :H][None, :, :]
    c_T = c_out[:, :H][None, :, :]
    return preds, (h_T, c_T)


def worldmodel_forward(state, action, hidden, kparams):
    """Single-step forward — exact semantics of WorldModel.forward (T=1)."""
    y_seq, hid = worldmodel_rollout(state[None], action[None], hidden, kparams)
    return y_seq[0], hid


def init_raw_params(key, input_size, hidden_size, output_size):
    """Synthetic params in PyTorch layout (nn.LSTM + nn.Linear)."""
    ks = jax.random.split(key, 6)
    s = 1.0 / jnp.sqrt(hidden_size)
    w_ih = jax.random.uniform(ks[0], (4 * hidden_size, input_size), jnp.float32, -s, s)
    w_hh = jax.random.uniform(ks[1], (4 * hidden_size, hidden_size), jnp.float32, -s, s)
    b_ih = jax.random.uniform(ks[2], (4 * hidden_size,), jnp.float32, -s, s)
    b_hh = jax.random.uniform(ks[3], (4 * hidden_size,), jnp.float32, -s, s)
    w_dec = jax.random.uniform(ks[4], (output_size, hidden_size), jnp.float32, -s, s)
    b_dec = jax.random.uniform(ks[5], (output_size,), jnp.float32, -s, s)
    return {"w_ih": w_ih, "w_hh": w_hh, "b_ih": b_ih, "b_hh": b_hh,
            "w_dec": w_dec, "b_dec": b_dec}


def prepare_kernel_params(raw, state_size, action_size, hidden_size, output_size):
    """Build fused / padded / bf16 kernel weights from PyTorch-layout params.

    K layout (rows of w_cat):
      [0, state_size)         : state weights (w_ih state columns, transposed)
      [SP, SP + H)            : hidden weights (w_hh, transposed)
      [SP + H, SP + H + A)    : action weights (w_ih action columns, transposed)
      rest                    : zero padding
    so K_pad = SP + HP (action shares the hidden gate block's lane padding).
    """
    H, A = hidden_size, action_size
    HP = _round_up(H, 128)
    assert H + A <= HP, "action must fit in the hidden block's lane padding"
    SP = _round_up(state_size, 128)
    KP = SP + HP
    OP = _round_up(output_size, 128)

    w_ih = raw["w_ih"]                           # [4H, state_size + A]
    w_hh = raw["w_hh"]                           # [4H, H]
    bias = raw["b_ih"] + raw["b_hh"]             # [4H]

    w_cat = jnp.zeros((KP, 4 * HP), jnp.float32)
    b_cat = jnp.zeros((1, 4 * HP), jnp.float32)
    for g in range(4):                           # PyTorch gate order: i, f, g, o
        wg_ih = w_ih[g * H:(g + 1) * H, :]       # [H, state_size + A]
        wg_hh = w_hh[g * H:(g + 1) * H, :]       # [H, H]
        col = g * HP
        w_cat = w_cat.at[0:state_size, col:col + H].set(wg_ih[:, :state_size].T)
        w_cat = w_cat.at[SP:SP + H, col:col + H].set(wg_hh.T)
        w_cat = w_cat.at[SP + H:SP + H + A, col:col + H].set(wg_ih[:, state_size:].T)
        b_cat = b_cat.at[0, col:col + H].set(bias[g * H:(g + 1) * H])

    w_dec = jnp.zeros((HP, OP), jnp.float32)
    w_dec = w_dec.at[0:H, 0:output_size].set(raw["w_dec"].T)
    b_dec = jnp.zeros((1, OP), jnp.float32)
    b_dec = b_dec.at[0, 0:output_size].set(raw["b_dec"])

    dims = dict(state_size=state_size, action_size=action_size,
                hidden_size=H, output_size=output_size,
                s_pad=SP, h_pad=HP, k_pad=KP, o_pad=OP)
    return {
        "w_cat": w_cat.astype(jnp.bfloat16),
        "b_cat": b_cat,
        "w_dec": w_dec.astype(jnp.bfloat16),
        "b_dec": b_dec,
        "dims": dims,
    }


def _reference_rollout(states, actions, hidden, raw):
    """Pure-JAX reference (scan) with the same bf16-weight / f32-acc numerics."""
    T, B = states.shape[0], states.shape[1]
    states_flat = states.reshape(T, B, -1)
    actions = actions.reshape(T, B, -1)
    h = hidden[0].reshape(B, -1)
    c = hidden[1].reshape(B, -1)
    H = h.shape[-1]
    w_ih = raw["w_ih"].astype(jnp.bfloat16)
    w_hh = raw["w_hh"].astype(jnp.bfloat16)
    w_dec = raw["w_dec"].astype(jnp.bfloat16)
    b = raw["b_ih"] + raw["b_hh"]

    def step(carry, inp):
        h, c = carry
        s, a = inp
        x = jnp.concatenate([s, a], axis=-1)
        gates = (
            jnp.dot(x.astype(jnp.bfloat16), w_ih.T, preferred_element_type=jnp.float32)
            + jnp.dot(h.astype(jnp.bfloat16), w_hh.T, preferred_element_type=jnp.float32)
            + b
        )
        i = jax.nn.sigmoid(gates[:, 0 * H:1 * H])
        f = jax.nn.sigmoid(gates[:, 1 * H:2 * H])
        g = jnp.tanh(gates[:, 2 * H:3 * H])
        o = jax.nn.sigmoid(gates[:, 3 * H:4 * H])
        c_new = f * c + i * g
        h_new = o * jnp.tanh(c_new)
        y = (
            jnp.dot(h_new.astype(jnp.bfloat16), w_dec.T,
                    preferred_element_type=jnp.float32)
            + raw["b_dec"]
        )
        return (h_new, c_new), y

    (h, c), ys = jax.lax.scan(step, (h, c), (states_flat, actions))
    return ys, (h[None], c[None])


if __name__ == "__main__":
    # Small shapes consistent with the module's forward:
    # state [B, 3, S, S] -> state_size = 3*S*S, action_size = 3,
    # input_size = state_size + action_size, output_size = state_size.
    B, C, S = 2, 3, 16
    T = 8
    action_size = 3
    hidden_size = 32
    state_size = C * S * S                  # 768
    input_size = state_size + action_size   # 771
    output_size = state_size                # 768

    key = jax.random.PRNGKey(0)
    ks = jax.random.split(key, 5)
    states = jax.random.normal(ks[0], (T, B, C, S, S), jnp.float32)
    actions = jax.random.normal(ks[1], (T, B, action_size), jnp.float32)
    h0 = jax.random.normal(ks[2], (1, B, hidden_size), jnp.float32)
    c0 = jax.random.normal(ks[3], (1, B, hidden_size), jnp.float32)

    raw = init_raw_params(ks[4], input_size, hidden_size, output_size)
    kparams = prepare_kernel_params(raw, state_size, action_size,
                                    hidden_size, output_size)

    # --- Single-step forward (the module's forward) -------------------------
    y1, (h1, c1) = worldmodel_forward(states[0], actions[0], (h0, c0), kparams)
    jax.block_until_ready((y1, h1, c1))
    y1_ref, (h1_ref, c1_ref) = _reference_rollout(states[:1], actions[:1],
                                                  (h0, c0), raw)
    assert y1.shape == (B, output_size)
    assert h1.shape == (1, B, hidden_size) and c1.shape == (1, B, hidden_size)
    assert jnp.allclose(y1, y1_ref[0], atol=3e-3, rtol=3e-3)
    assert jnp.allclose(h1, h1_ref, atol=3e-3, rtol=3e-3)
    assert jnp.allclose(c1, c1_ref, atol=3e-3, rtol=3e-3)

    # --- Multi-step rollout: weights stay VMEM-resident across the T loop ---
    ys, (hT, cT) = worldmodel_rollout(states, actions, (h0, c0), kparams)
    jax.block_until_ready((ys, hT, cT))
    ys_ref, (hT_ref, cT_ref) = _reference_rollout(states, actions, (h0, c0), raw)
    assert ys.shape == (T, B, output_size)
    assert jnp.allclose(ys, ys_ref, atol=5e-3, rtol=5e-3)
    assert jnp.allclose(hT, hT_ref, atol=5e-3, rtol=5e-3)
    assert jnp.allclose(cT, cT_ref, atol=5e-3, rtol=5e-3)

    print("KERNEL_OK")
</pallas_src>

<mosaic_0001>
module attributes {stable_mosaic.version = 11 : i64} {
  func.func @_worldmodel_kernel(%arg0: i32, %arg1: memref<1x2x768xf32, #tpu.memory_space<vmem>>, %arg2: memref<1x2x128xf32, #tpu.memory_space<vmem>>, %arg3: memref<2x128xf32, #tpu.memory_space<vmem>>, %arg4: memref<2x128xf32, #tpu.memory_space<vmem>>, %arg5: memref<896x512xbf16, #tpu.memory_space<vmem>>, %arg6: memref<1x512xf32, #tpu.memory_space<vmem>>, %arg7: memref<128x768xbf16, #tpu.memory_space<vmem>>, %arg8: memref<1x768xf32, #tpu.memory_space<vmem>>, %arg9: memref<1x2x768xf32, #tpu.memory_space<vmem>>, %arg10: memref<2x128xf32, #tpu.memory_space<vmem>>, %arg11: memref<2x128xf32, #tpu.memory_space<vmem>>, %arg12: memref<2x896xbf16, #tpu.memory_space<vmem>>) attributes {dimension_semantics = [#tpu.dimension_semantics<arbitrary>], iteration_bounds = array<i64: 1>, scalar_prefetch = 0 : i64, scratch_operands = 1 : i64, tpu.core_type = #tpu.core_type<tc>, window_params = [{transform_indices = @transform_0, window_bounds = array<i64: 1, 2, 768>}, {transform_indices = @transform_1, window_bounds = array<i64: 1, 2, 128>}, {pipeline_mode = #tpu.pipeline_mode<synchronous>, transform_indices = @transform_2, window_bounds = array<i64: 2, 128>}, {pipeline_mode = #tpu.pipeline_mode<synchronous>, transform_indices = @transform_3, window_bounds = array<i64: 2, 128>}, {pipeline_mode = #tpu.pipeline_mode<synchronous>, transform_indices = @transform_4, window_bounds = array<i64: 896, 512>}, {pipeline_mode = #tpu.pipeline_mode<synchronous>, transform_indices = @transform_5, window_bounds = array<i64: 1, 512>}, {pipeline_mode = #tpu.pipeline_mode<synchronous>, transform_indices = @transform_6, window_bounds = array<i64: 128, 768>}, {pipeline_mode = #tpu.pipeline_mode<synchronous>, transform_indices = @transform_7, window_bounds = array<i64: 1, 768>}, {transform_indices = @transform_8, window_bounds = array<i64: 1, 2, 768>}, {pipeline_mode = #tpu.pipeline_mode<synchronous>, transform_indices = @transform_9, window_bounds = array<i64: 2, 128>}, {pipeline_mode = #tpu.pipeline_mode<synchronous>, transform_indices = @transform_10, window_bounds = array<i64: 2, 128>}]} {
    %c0_i32 = arith.constant 0 : i32
    %0 = arith.cmpi eq, %arg0, %c0_i32 : i32
    %1 = arith.extui %0 : i1 to i32
    %c0_i32_0 = arith.constant 0 : i32
    %2 = arith.cmpi ne, %1, %c0_i32_0 : i32
    scf.if %2 {
      %c0_34 = arith.constant 0 : index
      %c0_35 = arith.constant 0 : index
      %56 = vector.load %arg3[%c0_34, %c0_35] : memref<2x128xf32, #tpu.memory_space<vmem>>, vector<2x128xf32>
      %c0_36 = arith.constant 0 : index
      %c0_37 = arith.constant 0 : index
      %57 = vector.load %arg10[%c0_36, %c0_37] : memref<2x128xf32, #tpu.memory_space<vmem>>, vector<2x128xf32>
      tpu.vector_store %arg10[%c0_36, %c0_37], %56 {strides = array<i32>} : memref<2x128xf32, #tpu.memory_space<vmem>>, vector<2x128xf32>,
      %c0_38 = arith.constant 0 : index
      %c0_39 = arith.constant 0 : index
      %58 = vector.load %arg4[%c0_38, %c0_39] : memref<2x128xf32, #tpu.memory_space<vmem>>, vector<2x128xf32>
      %c0_40 = arith.constant 0 : index
      %c0_41 = arith.constant 0 : index
      %59 = vector.load %arg11[%c0_40, %c0_41] : memref<2x128xf32, #tpu.memory_space<vmem>>, vector<2x128xf32>
      tpu.vector_store %arg11[%c0_40, %c0_41], %58 {strides = array<i32>} : memref<2x128xf32, #tpu.memory_space<vmem>>, vector<2x128xf32>,
    } else {
    }
    %c0 = arith.constant 0 : index
    %c0_1 = arith.constant 0 : index
    %c0_2 = arith.constant 0 : index
    %3 = vector.load %arg1[%c0, %c0_1, %c0_2] : memref<1x2x768xf32, #tpu.memory_space<vmem>>, vector<1x2x768xf32>
    %4 = vector.shape_cast %3 : vector<1x2x768xf32> to vector<2x768xf32>
    %5 = arith.truncf %4 : vector<2x768xf32> to vector<2x768xbf16>
    %c0_3 = arith.constant 0 : index
    %c0_4 = arith.constant 0 : index
    %6 = vector.load %arg12[%c0_3, %c0_4] : memref<2x896xbf16, #tpu.memory_space<vmem>>, vector<2x768xbf16>
    tpu.vector_store %arg12[%c0_3, %c0_4], %5 {strides = array<i32>} : memref<2x896xbf16, #tpu.memory_space<vmem>>, vector<2x768xbf16>,
    %c0_5 = arith.constant 0 : index
    %c0_6 = arith.constant 0 : index
    %7 = vector.load %arg10[%c0_5, %c0_6] : memref<2x128xf32, #tpu.memory_space<vmem>>, vector<2x128xf32>
    %c0_7 = arith.constant 0 : index
    %c0_8 = arith.constant 0 : index
    %c0_9 = arith.constant 0 : index
    %8 = vector.load %arg2[%c0_7, %c0_8, %c0_9] : memref<1x2x128xf32, #tpu.memory_space<vmem>>, vector<1x2x128xf32>
    %9 = vector.shape_cast %8 : vector<1x2x128xf32> to vector<2x128xf32>
    %10 = arith.addf %7, %9 : vector<2x128xf32>
    %11 = arith.truncf %10 : vector<2x128xf32> to vector<2x128xbf16>
    %c0_10 = arith.constant 0 : index
    %c768 = arith.constant 768 : index
    %12 = vector.load %arg12[%c0_10, %c768] : memref<2x896xbf16, #tpu.memory_space<vmem>>, vector<2x128xbf16>
    tpu.vector_store %arg12[%c0_10, %c768], %11 {strides = array<i32>} : memref<2x896xbf16, #tpu.memory_space<vmem>>, vector<2x128xbf16>,
    %c0_11 = arith.constant 0 : index
    %c0_12 = arith.constant 0 : index
    %13 = vector.load %arg12[%c0_11, %c0_12] : memref<2x896xbf16, #tpu.memory_space<vmem>>, vector<2x896xbf16>
    %c0_13 = arith.constant 0 : index
    %c0_14 = arith.constant 0 : index
    %14 = vector.load %arg5[%c0_13, %c0_14] : memref<896x512xbf16, #tpu.memory_space<vmem>>, vector<896x512xbf16>
    %cst = arith.constant dense<0.000000e+00> : vector<2x512xf32>
    %15 = tpu.matmul %13, %14, %cst {dimension_numbers = #tpu.dot_dimension_numbers<[1], [0], [0], [1], [0, 0, 1, 1], [], []>} : vector<2x896xbf16>, vector<896x512xbf16>, vector<2x512xf32> -> vector<2x512xf32>
    %c0_15 = arith.constant 0 : index
    %c0_16 = arith.constant 0 : index
    %16 = vector.load %arg6[%c0_15, %c0_16] : memref<1x512xf32, #tpu.memory_space<vmem>>, vector<1x512xf32>
    %17 = vector.broadcast %16 : vector<1x512xf32> to vector<2x512xf32>
    %18 = arith.addf %15, %17 : vector<2x512xf32>
    %19 = vector.extract_strided_slice %18 {offsets = [0, 0], sizes = [2, 128], strides = [1, 1]} : vector<2x512xf32> to vector<2x128xf32>
    %20 = arith.negf %19 : vector<2x128xf32>
    %21 = math.exp %20 : vector<2x128xf32>
    %cst_17 = arith.constant 1.000000e+00 : f32
    %22 = vector.broadcast %cst_17 : f32 to vector<2x128xf32>
    %23 = arith.addf %22, %21 : vector<2x128xf32>
    %24 = arith.divf %22, %23 : vector<2x128xf32>
    %25 = vector.extract_strided_slice %18 {offsets = [0, 128], sizes = [2, 128], strides = [1, 1]} : vector<2x512xf32> to vector<2x128xf32>
    %26 = arith.negf %25 : vector<2x128xf32>
    %27 = math.exp %26 : vector<2x128xf32>
    %cst_18 = arith.constant 1.000000e+00 : f32
    %28 = vector.broadcast %cst_18 : f32 to vector<2x128xf32>
    %29 = arith.addf %28, %27 : vector<2x128xf32>
    %30 = arith.divf %28, %29 : vector<2x128xf32>
    %31 = vector.extract_strided_slice %18 {offsets = [0, 256], sizes = [2, 128], strides = [1, 1]} : vector<2x512xf32> to vector<2x128xf32>
    %32 = math.tanh %31 : vector<2x128xf32>
    %33 = vector.extract_strided_slice %18 {offsets = [0, 384], sizes = [2, 128], strides = [1, 1]} : vector<2x512xf32> to vector<2x128xf32>
    %34 = arith.negf %33 : vector<2x128xf32>
    %35 = math.exp %34 : vector<2x128xf32>
    %cst_19 = arith.constant 1.000000e+00 : f32
    %36 = vector.broadcast %cst_19 : f32 to vector<2x128xf32>
    %37 = arith.addf %36, %35 : vector<2x128xf32>
    %38 = arith.divf %36, %37 : vector<2x128xf32>
    %c0_20 = arith.constant 0 : index
    %c0_21 = arith.constant 0 : index
    %39 = vector.load %arg11[%c0_20, %c0_21] : memref<2x128xf32, #tpu.memory_space<vmem>>, vector<2x128xf32>
    %40 = arith.mulf %30, %39 : vector<2x128xf32>
    %41 = arith.mulf %24, %32 : vector<2x128xf32>
    %42 = arith.addf %40, %41 : vector<2x128xf32>
    %43 = math.tanh %42 : vector<2x128xf32>
    %44 = arith.mulf %38, %43 : vector<2x128xf32>
    %c0_22 = arith.constant 0 : index
    %c0_23 = arith.constant 0 : index
    %45 = vector.load %arg11[%c0_22, %c0_23] : memref<2x128xf32, #tpu.memory_space<vmem>>, vector<2x128xf32>
    tpu.vector_store %arg11[%c0_22, %c0_23], %42 {strides = array<i32>} : memref<2x128xf32, #tpu.memory_space<vmem>>, vector<2x128xf32>,
    %c0_24 = arith.constant 0 : index
    %c0_25 = arith.constant 0 : index
    %46 = vector.load %arg10[%c0_24, %c0_25] : memref<2x128xf32, #tpu.memory_space<vmem>>, vector<2x128xf32>
    tpu.vector_store %arg10[%c0_24, %c0_25], %44 {strides = array<i32>} : memref<2x128xf32, #tpu.memory_space<vmem>>, vector<2x128xf32>,
    %47 = arith.truncf %44 : vector<2x128xf32> to vector<2x128xbf16>
    %c0_26 = arith.constant 0 : index
    %c0_27 = arith.constant 0 : index
    %48 = vector.load %arg7[%c0_26, %c0_27] : memref<128x768xbf16, #tpu.memory_space<vmem>>, vector<128x768xbf16>
    %cst_28 = arith.constant dense<0.000000e+00> : vector<2x768xf32>
    %49 = tpu.matmul %47, %48, %cst_28 {dimension_numbers = #tpu.dot_dimension_numbers<[1], [0], [0], [1], [0, 0, 1, 1], [], []>} : vector<2x128xbf16>, vector<128x768xbf16>, vector<2x768xf32> -> vector<2x768xf32>
    %c0_29 = arith.constant 0 : index
    %c0_30 = arith.constant 0 : index
    %50 = vector.load %arg8[%c0_29, %c0_30] : memref<1x768xf32, #tpu.memory_space<vmem>>, vector<1x768xf32>
    %51 = vector.broadcast %50 : vector<1x768xf32> to vector<2x768xf32>
    %52 = arith.addf %49, %51 : vector<2x768xf32>
    %c0_31 = arith.constant 0 : index
    %c0_32 = arith.constant 0 : index
    %c0_33 = arith.constant 0 : index
    %53 = vector.load %arg9[%c0_31, %c0_32, %c0_33] : memref<1x2x768xf32, #tpu.memory_space<vmem>>, vector<1x2x768xf32>
    %54 = vector.shape_cast %53 : vector<1x2x768xf32> to vector<2x768xf32>
    %55 = vector.shape_cast %52 : vector<2x768xf32> to vector<1x2x768xf32>
    tpu.vector_store %arg9[%c0_31, %c0_32, %c0_33], %55 {strides = array<i32>} : memref<1x2x768xf32, #tpu.memory_space<vmem>>, vector<1x2x768xf32>,
    return
  }
  func.func @transform_0(%arg0: i32) -> (i32, i32, i32) {
    %c0_i32 = arith.constant 0 : i32
    %c0_i32_0 = arith.constant 0 : i32
    %c0_i32_1 = arith.constant 0 : i32
    return %arg0, %c0_i32, %c0_i32_0 : i32, i32, i32
  }
  func.func @transform_1(%arg0: i32) -> (i32, i32, i32) {
    %c0_i32 = arith.constant 0 : i32
    %c0_i32_0 = arith.constant 0 : i32
    %c0_i32_1 = arith.constant 0 : i32
    return %arg0, %c0_i32, %c0_i32_0 : i32, i32, i32
  }
  func.func @transform_2(%arg0: i32) -> (i32, i32) {
    %c0_i32 = arith.constant 0 : i32
    %c0_i32_0 = arith.constant 0 : i32
    %c0_i32_1 = arith.constant 0 : i32
    return %c0_i32, %c0_i32_0 : i32, i32
  }
  func.func @transform_3(%arg0: i32) -> (i32, i32) {
    %c0_i32 = arith.constant 0 : i32
    %c0_i32_0 = arith.constant 0 : i32
    %c0_i32_1 = arith.constant 0 : i32
    return %c0_i32, %c0_i32_0 : i32, i32
  }
  func.func @transform_4(%arg0: i32) -> (i32, i32) {
    %c0_i32 = arith.constant 0 : i32
    %c0_i32_0 = arith.constant 0 : i32
    %c0_i32_1 = arith.constant 0 : i32
    return %c0_i32, %c0_i32_0 : i32, i32
  }
  func.func @transform_5(%arg0: i32) -> (i32, i32) {
    %c0_i32 = arith.constant 0 : i32
    %c0_i32_0 = arith.constant 0 : i32
    %c0_i32_1 = arith.constant 0 : i32
    return %c0_i32, %c0_i32_0 : i32, i32
  }
  func.func @transform_6(%arg0: i32) -> (i32, i32) {
    %c0_i32 = arith.constant 0 : i32
    %c0_i32_0 = arith.constant 0 : i32
    %c0_i32_1 = arith.constant 0 : i32
    return %c0_i32, %c0_i32_0 : i32, i32
  }
  func.func @transform_7(%arg0: i32) -> (i32, i32) {
    %c0_i32 = arith.constant 0 : i32
    %c0_i32_0 = arith.constant 0 : i32
    %c0_i32_1 = arith.constant 0 : i32
    return %c0_i32, %c0_i32_0 : i32, i32
  }
  func.func @transform_8(%arg0: i32) -> (i32, i32, i32) {
    %c0_i32 = arith.constant 0 : i32
    %c0_i32_0 = arith.constant 0 : i32
    %c0_i32_1 = arith.constant 0 : i32
    return %arg0, %c0_i32, %c0_i32_0 : i32, i32, i32
  }
  func.func @transform_9(%arg0: i32) -> (i32, i32) {
    %c0_i32 = arith.constant 0 : i32
    %c0_i32_0 = arith.constant 0 : i32
    %c0_i32_1 = arith.constant 0 : i32
    return %c0_i32, %c0_i32_0 : i32, i32
  }
  func.func @transform_10(%arg0: i32) -> (i32, i32) {
    %c0_i32 = arith.constant 0 : i32
    %c0_i32_0 = arith.constant 0 : i32
    %c0_i32_1 = arith.constant 0 : i32
    return %c0_i32, %c0_i32_0 : i32, i32
  }
}

</mosaic_0001>

<bundles_post_ra>
// kernel: tpu_custom_call.1
= control target key start
LH: loop header
LB: loop body
LE: loop exit
PB: predicated region body
PF: predicated region fallthrough
CT: control target
= control target key end

     0   :  { %16 = vsyncpa [#allocation4], 0  ;;  %s4273_s0 = inlined_call_operand.hbm [shape: f32[1,2,768], index: 0, kind: input, shape index: {}]   ;;  %s4274_s1 = inlined_call_operand.hbm [shape: f32[1,2,128], index: 1, kind: input, shape index: {}]   ;;  %s4275_s2 = inlined_call_operand.hbm [shape: f32[2,128], index: 2, kind: input, shape index: {}]   ;;  %s4276_s3 = inlined_call_operand.hbm [shape: f32[2,128], index: 3, kind: input, shape index: {}]   ;;  %s4277_s4 = inlined_call_operand.hbm [shape: bf16[896,512], index: 4, kind: input, shape index: {}]   ;;  %s4278_s5 = inlined_call_operand.hbm [shape: f32[1,512], index: 5, kind: input, shape index: {}]   ;;  %s4279_s6 = inlined_call_operand.hbm [shape: bf16[128,768], index: 6, kind: input, shape index: {}]   ;;  %s4280_s7 = inlined_call_operand.vmem [shape: f32[1,768], index: 7, kind: input, shape index: {}]   ;;  %s4281_s8 = inlined_call_operand.hbm [shape: f32[1,2,768], index: 8, kind: output, shape index: {0}]   ;;  %s4282_s9 = inlined_call_operand.hbm [shape: f32[2,128], index: 9, kind: output, shape index: {1}]   ;;  %s4283_s10 = inlined_call_operand.hbm [shape: f32[2,128], index: 10, kind: output, shape index: {2}]  }
   0x1   :  { %17 = vsyncpa [#allocation7], 0 }
   0x2   :  { %18 = vsyncpa [#allocation10], 0 }
   0x3   :  { %19 = vsyncpa [#allocation13], 0 }
   0x4   :  { %20 = vsyncpa [#allocation5], 0  ;;  %s38_s15 = sshll.u32 %s4274_s1, 4  ;;  %s39_s15 = int_to_ptr.hbm [resolvable:$true] %s38_s15 }
   0x5   :  { %21 = vsyncpa [#allocation17], 0  ;;  %s4099_s16 = smov [#allocation6]   ;;  %s60_s20 = sshll.u32 %s4276_s3, 4  ;;  %s61_s20 = int_to_ptr.hbm [resolvable:$true] %s60_s20 }
   0x6   :  { %s40_s17 = sshll.u32 %s4099_s16, 4  ;;  %s4100_s21 = smov [#allocation9]   ;;  %s41_s17 = int_to_ptr.vmem [resolvable:$true] %s40_s17 }
   0x7   :  { %43 = dma.hbm_to_vmem [thread:$0]  %s39_s15, 32, %s41_s17, [#allocation7]  }
   0x8   :  { %s62_s22 = sshll.u32 %s4100_s21, 4  ;;  %s84_s25 = sshll.u32 %s4278_s5, 4  ;;  %s63_s22 = int_to_ptr.vmem [resolvable:$true] %s62_s22  ;;  %s85_s25 = int_to_ptr.hbm [resolvable:$true] %s84_s25 }
   0x9   :  { %65 = dma.hbm_to_vmem [thread:$0]  %s61_s20, 32, %s63_s22, [#allocation10]  }
   0xa   :  { %s27_s27 = sshll.u32 %s4273_s0, 4  ;;  %s4101_s28 = smov [#allocation12]   ;;  %s28_s27 = int_to_ptr.hbm [resolvable:$true] %s27_s27 }
   0xb   :  { %s86_s29 = sshll.u32 %s4101_s28, 4  ;;  %s4102_s3 = smov [#allocation3]   ;;  %s87_s29 = int_to_ptr.vmem [resolvable:$true] %s86_s29 }
   0xc   :  { %89 = dma.hbm_to_vmem [thread:$0]  %s85_s25, 64, %s87_s29, [#allocation13]  }
   0xd   :  { %s29_s30 = sshll.u32 %s4102_s3, 4  ;;  %s49_s13 = sshll.u32 %s4275_s2, 4  ;;  %s30_s30 = int_to_ptr.vmem [resolvable:$true] %s29_s30  ;;  %s50_s13 = int_to_ptr.hbm [resolvable:$true] %s49_s13 }
   0xe   :  { %32 = dma.hbm_to_vmem [thread:$0]  %s28_s27, 192, %s30_s30, [#allocation4]  }
   0xf   :  { %s70_s15 = sshll.u32 %s4277_s4, 4  ;;  %s4103_s16 = smov [#allocation8]   ;;  %s71_s15 = int_to_ptr.hbm [resolvable:$true] %s70_s15 }
  0x10   :  { %s51_s0 = sshll.u32 %s4103_s16, 4  ;;  %s4104_s17 = smov [#allocation11]   ;;  %s52_s0 = int_to_ptr.vmem [resolvable:$true] %s51_s0 }
  0x11   :  { %54 = dma.hbm_to_vmem [thread:$0]  %s50_s13, 32, %s52_s0, [#allocation7]  }
  0x12   :  { %s72_s18 = sshll.u32 %s4104_s17, 4  ;;  %s4105_s19 = smov 256   ;;  %s73_s18 = int_to_ptr.vmem [resolvable:$true] %s72_s18 }
  0x13   :  { %s4106_s20 = smov 16   ;;  %s94_s22 = sshll.u32 %s4279_s6, 4  ;;  %s95_s22 = int_to_ptr.hbm [resolvable:$true] %s94_s22 }
  0x14   :  { %78 = dma.hbm_to_vmem [thread:$0]  %s71_s15, 28672, %s73_s18, [#allocation10], %s4105_s19, %s4105_s19, %s4106_s20  }
  0x15   :  { %s4107_s23 = smov [#allocation14]   ;;  %s4108_s4 = smov 384  }
  0x16   :  { %s96_s24 = sshll.u32 %s4107_s23, 4  ;;  %s4109_s25 = smov 24   ;;  %s97_s24 = int_to_ptr.vmem [resolvable:$true] %s96_s24 }
  0x17   :  { %102 = dma.hbm_to_vmem [thread:$0]  %s95_s22, 6144, %s97_s24, [#allocation13], %s4108_s4, %s4108_s4, %s4109_s25  }
  0x18   :  { %4087 = dma.done.wait [#allocation4], 192  }
  0x19   :  { %4088 = vsyncadd [#allocation4], 4294967104 }
  0x1a   :  { %4089 = dma.done.wait [#allocation7], 64  }
  0x1b   :  { %4090 = vsyncadd [#allocation7], 4294967232 }
  0x1c   :  { %4091 = dma.done.wait [#allocation10], 28704  }
  0x1d   :  { %4092 = vsyncadd [#allocation10], 4294938592 }
  0x1e   :  { %4093 = dma.done.wait [#allocation13], 6208  }
  0x1f   :  { %4094 = vsyncadd [#allocation13], 4294961088  ;;  %v2561_v0 = vld [vmem:[#allocation11 + $0xe0] sm:$0xf]  ;;  %v3568_v1 = vld [vmem:[#allocation11 + $0xec] sm:$0xf0] }
  0x20   :  { %v2689_v2 = vld [vmem:[#allocation11 + $0x1e0] sm:$0xf]  ;;  %v2562_v3 = vor.u32 %v3568_v1, %v2561_v0  ;;  %v3600_v4 = vld [vmem:[#allocation11 + $0x1ec] sm:$0xf0]  ;;  %vm171_vm0 = vcmask 1040384   ;;  %vm175_vm1 = vcmask 1041408  }
  0x21   :  { %v2817_v5 = vld [vmem:[#allocation11 + $0x2e0] sm:$0xf]  ;;  %v3632_v6 = vld [vmem:[#allocation11 + $0x2ec] sm:$0xf0]  ;;  %v2690_v7 = vor.u32 %v3600_v4, %v2689_v2  ;;  %vm178_vm2 = vcmask 1043459   ;;  %vm182_vm3 = vcmask 1044483  }
  0x22   :  { %v2818_v8 = vor.u32 %v3632_v6, %v2817_v5  ;;  %v2945_v9 = vld [vmem:[#allocation11 + $0x3e0] sm:$0xf]  ;;  %v3664_v10 = vld [vmem:[#allocation11 + $0x3ec] sm:$0xf0]  ;;  %1565 = vmatpush.bf16.msra.mxu0 %v2562_v3  ;;  %vm185_vm4 = vcmask 1042432   ;;  %s2414_s26 = sshll.u32 %s4282_s9, 4  ;;  %s2415_s26 = int_to_ptr.hbm [resolvable:$true] %s2414_s26 }
  0x23   :  { %v2545_v11 = vld [vmem:[#allocation11 + $0xc0] sm:$0xf]  ;;  %v2946_v12 = vor.u32 %v3664_v10, %v2945_v9  ;;  %v3564_v13 = vld [vmem:[#allocation11 + $0xcc] sm:$0xf0]  ;;  %1578 = vmatpush.bf16.msra.mxu1 %v2690_v7  ;;  %s4110_s27 = smov [#allocation16]   ;;  %s2425_s30 = sshll.u32 %s4283_s10, 4  ;;  %s2426_s30 = int_to_ptr.hbm [resolvable:$true] %s2425_s30 }
  0x24   :  { %v2673_v14 = vld [vmem:[#allocation11 + $0x1c0] sm:$0xf]  ;;  %v3596_v15 = vld [vmem:[#allocation11 + $0x1cc] sm:$0xf0]  ;;  %1591 = vmatpush.bf16.msra.mxu2 %v2818_v8  ;;  %v2546_v16 = vor.u32 %v3564_v13, %v2545_v11  ;;  %s2412_s28 = sshll.u32 %s4110_s27, 4  ;;  %s4111_s11 = smov [#allocation18]   ;;  %s2413_s28 = int_to_ptr.vmem [resolvable:$true] %s2412_s28 }
  0x25   :  { %v2674_v17 = vor.u32 %v3596_v15, %v2673_v14  ;;  %v2801_v18 = vld [vmem:[#allocation11 + $0x2c0] sm:$0xf]  ;;  %v3628_v19 = vld [vmem:[#allocation11 + $0x2cc] sm:$0xf0]  ;;  %1604 = vmatpush.bf16.msra.mxu3 %v2946_v12  ;;  %s2423_s12 = sshll.u32 %s4111_s11, 4  ;;  %s2403_s15 = sshll.u32 %s4281_s8, 4  ;;  %s2424_s12 = int_to_ptr.vmem [resolvable:$true] %s2423_s12  ;;  %s2404_s15 = int_to_ptr.hbm [resolvable:$true] %s2403_s15 }
  0x26   :  { %v2929_v20 = vld [vmem:[#allocation11 + $0x3c0] sm:$0xf]  ;;  %v2802_v21 = vor.u32 %v3628_v19, %v2801_v18  ;;  %v3660_v22 = vld [vmem:[#allocation11 + $0x3cc] sm:$0xf0]  ;;  %1566 = vmatpush.bf16.msra.mxu0 %v2546_v16 }
  0x27   :  { %v2529_v23 = vld [vmem:[#allocation11 + $0xa0] sm:$0xf]  ;;  %v3560_v24 = vld [vmem:[#allocation11 + $0xac] sm:$0xf0]  ;;  %v2930_v25 = vor.u32 %v3660_v22, %v2929_v20  ;;  %1579 = vmatpush.bf16.msra.mxu1 %v2674_v17 }
  0x28   :  { %v2657_v26 = vld [vmem:[#allocation11 + $0x1a0] sm:$0xf]  ;;  %v3592_v27 = vld [vmem:[#allocation11 + $0x1ac] sm:$0xf0]  ;;  %v2530_v29 = vor.u32 %v3560_v24, %v2529_v23  ;;  %1592 = vmatpush.bf16.msra.mxu2 %v2802_v21 }
  0x29   :  { %v2785_v28 = vld [vmem:[#allocation11 + $0x2a0] sm:$0xf]  ;;  %v3624_v30 = vld [vmem:[#allocation11 + $0x2ac] sm:$0xf0]  ;;  %v2658_v33 = vor.u32 %v3592_v27, %v2657_v26  ;;  %1605 = vmatpush.bf16.msra.mxu3 %v2930_v25 }
  0x2a   :  { %v2913_v31 = vld [vmem:[#allocation11 + $0x3a0] sm:$0xf]  ;;  %v3656_v32 = vld [vmem:[#allocation11 + $0x3ac] sm:$0xf0]  ;;  %v2786_v34 = vor.u32 %v3624_v30, %v2785_v28  ;;  %1567 = vmatpush.bf16.msra.mxu0 %v2530_v29 }
  0x2b   :  { %v2513_v35 = vld [vmem:[#allocation11 + $0x80] sm:$0xf]  ;;  %v3556_v36 = vld [vmem:[#allocation11 + $0x8c] sm:$0xf0]  ;;  %v2914_v38 = vor.u32 %v3656_v32, %v2913_v31  ;;  %1580 = vmatpush.bf16.msra.mxu1 %v2658_v33 }
  0x2c   :  { %v2641_v37 = vld [vmem:[#allocation11 + $0x180] sm:$0xf]  ;;  %v3588_v39 = vld [vmem:[#allocation11 + $0x18c] sm:$0xf0]  ;;  %v2514_v44 = vor.u32 %v3556_v36, %v2513_v35  ;;  %1593 = vmatpush.bf16.msra.mxu2 %v2786_v34 }
  0x2d   :  { %v2769_v40 = vld [vmem:[#allocation11 + $0x280] sm:$0xf]  ;;  %v3620_v41 = vld [vmem:[#allocation11 + $0x28c] sm:$0xf0]  ;;  %v2642_v45 = vor.u32 %v3588_v39, %v2641_v37  ;;  %1606 = vmatpush.bf16.msra.mxu3 %v2914_v38  ;;  %v3566_v37 = vld [vmem:[#allocation11 + $0xe4] sm:$0xf] }
  0x2e   :  { %v2897_v42 = vld [vmem:[#allocation11 + $0x380] sm:$0xf]  ;;  %v3652_v43 = vld [vmem:[#allocation11 + $0x38c] sm:$0xf0]  ;;  %v2770_v46 = vor.u32 %v3620_v41, %v2769_v40  ;;  %1568 = vmatpush.bf16.msra.mxu0 %v2514_v44  ;;  %v2563_v38 = vld [vmem:[#allocation11 + $0xf0] sm:$0xf0] }
  0x2f   :  { %v2497_v47 = vld [vmem:[#allocation11 + $0x60] sm:$0xf]  ;;  %v3552_v48 = vld [vmem:[#allocation11 + $0x6c] sm:$0xf0]  ;;  %v2898_v50 = vor.u32 %v3652_v43, %v2897_v42  ;;  %1581 = vmatpush.bf16.msra.mxu1 %v2642_v45 }
  0x30   :  { %v2625_v49 = vld [vmem:[#allocation11 + $0x160] sm:$0xf]  ;;  %v3584_v51 = vld [vmem:[#allocation11 + $0x16c] sm:$0xf0]  ;;  %v2498_v56 = vor.u32 %v3552_v48, %v2497_v47  ;;  %1594 = vmatpush.bf16.msra.mxu2 %v2770_v46  ;;  %v2566_v48 = vor.u32 %v3566_v37, %v2563_v38 }
  0x31   :  { %v2753_v52 = vld [vmem:[#allocation11 + $0x260] sm:$0xf]  ;;  %v3616_v53 = vld [vmem:[#allocation11 + $0x26c] sm:$0xf0]  ;;  %v2626_v57 = vor.u32 %v3584_v51, %v2625_v49  ;;  %1607 = vmatpush.bf16.msra.mxu3 %v2898_v50  ;;  %v3562_v50 = vld [vmem:[#allocation11 + $0xc4] sm:$0xf] }
  0x32   :  { %v2881_v54 = vld [vmem:[#allocation11 + $0x360] sm:$0xf]  ;;  %v3648_v55 = vld [vmem:[#allocation11 + $0x36c] sm:$0xf0]  ;;  %v2754_v58 = vor.u32 %v3616_v53, %v2753_v52  ;;  %1569 = vmatpush.bf16.msra.mxu0 %v2498_v56  ;;  %v2547_v51 = vld [vmem:[#allocation11 + $0xd0] sm:$0xf0] }
  0x33   :  { %v2481_v59 = vld [vmem:[#allocation11 + $0x40] sm:$0xf]  ;;  %v3548_v60 = vld [vmem:[#allocation11 + $0x4c] sm:$0xf0]  ;;  %v2882_v62 = vor.u32 %v3648_v55, %v2881_v54  ;;  %1582 = vmatpush.bf16.msra.mxu1 %v2626_v57  ;;  %v137_v54 = vld [vmem:[#allocation8] sm:$0x3] }
  0x34   :  { %v2609_v61 = vld [vmem:[#allocation11 + $0x140] sm:$0xf]  ;;  %v3580_v63 = vld [vmem:[#allocation11 + $0x14c] sm:$0xf0]  ;;  %v2482_v4 = vor.u32 %v3548_v60, %v2481_v59  ;;  %1595 = vmatpush.bf16.msra.mxu2 %v2754_v58  ;;  %v142_v56 = vld [vmem:[#allocation3 + $0x8] sm:$0xf] }
  0x35   :  { %v2737_v0 = vld [vmem:[#allocation11 + $0x240] sm:$0xf]  ;;  %v3612_v1 = vld [vmem:[#allocation11 + $0x24c] sm:$0xf0]  ;;  %v2610_v5 = vor.u32 %v3580_v63, %v2609_v61  ;;  %1608 = vmatpush.bf16.msra.mxu3 %v2882_v62  ;;  %138 = vst [vmem:[#allocation16] sm:$0x3] %v137_v54 }
  0x36   :  { %v2865_v2 = vld [vmem:[#allocation11 + $0x340] sm:$0xf]  ;;  %v3644_v3 = vld [vmem:[#allocation11 + $0x34c] sm:$0xf0]  ;;  %v2738_v6 = vor.u32 %v3612_v1, %v2737_v0  ;;  %1570 = vmatpush.bf16.msra.mxu0 %v2482_v4  ;;  %v2550_v0 = vor.u32 %v3562_v50, %v2547_v51  ;;  %v3558_v1 = vld [vmem:[#allocation11 + $0xa4] sm:$0xf] }
  0x37   :  { %v2465_v7 = vld [vmem:[#allocation11 + $0x20] sm:$0xf]  ;;  %v3544_v8 = vld [vmem:[#allocation11 + $0x2c] sm:$0xf0]  ;;  %v2866_v10 = vor.u32 %v3644_v3, %v2865_v2  ;;  %1583 = vmatpush.bf16.msra.mxu1 %v2610_v5  ;;  %v2531_v2 = vld [vmem:[#allocation11 + $0xb0] sm:$0xf0] }
  0x38   :  { %v2593_v9 = vld [vmem:[#allocation11 + $0x120] sm:$0xf]  ;;  %v3576_v11 = vld [vmem:[#allocation11 + $0x12c] sm:$0xf0]  ;;  %v2466_v16 = vor.u32 %v3544_v8, %v2465_v7  ;;  %1596 = vmatpush.bf16.msra.mxu2 %v2738_v6  ;;  %147 = vst [vmem:[#allocation1 + $0x20] ss:$4 sm:$0xff] %v142_v56 }
  0x39   :  { %v2721_v12 = vld [vmem:[#allocation11 + $0x220] sm:$0xf]  ;;  %v3608_v13 = vld [vmem:[#allocation11 + $0x22c] sm:$0xf0]  ;;  %v2594_v19 = vor.u32 %v3576_v11, %v2593_v9  ;;  %1609 = vmatpush.bf16.msra.mxu3 %v2866_v10  ;;  %v2534_v11 = vor.u32 %v3558_v1, %v2531_v2 }
  0x3a   :  { %v2849_v14 = vld [vmem:[#allocation11 + $0x320] sm:$0xf]  ;;  %v3640_v15 = vld [vmem:[#allocation11 + $0x32c] sm:$0xf0]  ;;  %v2722_v20 = vor.u32 %v3608_v13, %v2721_v12  ;;  %1571 = vmatpush.bf16.msra.mxu0 %v2466_v16  ;;  %v3554_v13 = vld [vmem:[#allocation11 + $0x84] sm:$0xf] }
  0x3b   :  { %v2449_v17 = vld [vmem:[#allocation11] sm:$0xf]  ;;  %v3540_v18 = vld [vmem:[#allocation11 + $0xc] sm:$0xf0]  ;;  %v2850_v24 = vor.u32 %v3640_v15, %v2849_v14  ;;  %1584 = vmatpush.bf16.msra.mxu1 %v2594_v19  ;;  %v190_v14 = vld [vmem:[#allocation6] sm:$0x3] }
  0x3c   :  { %v2577_v21 = vld [vmem:[#allocation11 + $0x100] sm:$0xf]  ;;  %v3572_v22 = vld [vmem:[#allocation11 + $0x10c] sm:$0xf0]  ;;  %v2450_v31 = vor.u32 %v3540_v18, %v2449_v17  ;;  %1597 = vmatpush.bf16.msra.mxu2 %v2722_v20  ;;  %v2515_v15 = vld [vmem:[#allocation11 + $0x90] sm:$0xf0] }
  0x3d   :  { %v2705_v23 = vld [vmem:[#allocation11 + $0x200] sm:$0xf]  ;;  %v3604_v25 = vld [vmem:[#allocation11 + $0x20c] sm:$0xf0]  ;;  %v2578_v35 = vor.u32 %v3572_v22, %v2577_v21  ;;  %1610 = vmatpush.bf16.msra.mxu3 %v2850_v24 }
  0x3e   :  { %v2833_v26 = vld [vmem:[#allocation11 + $0x300] sm:$0xf]  ;;  %v3636_v27 = vld [vmem:[#allocation11 + $0x30c] sm:$0xf0]  ;;  %v2706_v36 = vor.u32 %v3604_v25, %v2705_v23  ;;  %1572 = vmatpush.bf16.msra.mxu0 %v2450_v31 }
  0x3f   :  { %v3073_v28 = vld [vmem:[#allocation11 + $0x4e0] sm:$0xf]  ;;  %v3696_v29 = vld [vmem:[#allocation11 + $0x4ec] sm:$0xf0]  ;;  %v2834_v39 = vor.u32 %v3636_v27, %v2833_v26  ;;  %1585 = vmatpush.bf16.msra.mxu1 %v2578_v35 }
  0x40   :  { %v3201_v30 = vld [vmem:[#allocation11 + $0x5e0] sm:$0xf]  ;;  %v3728_v32 = vld [vmem:[#allocation11 + $0x5ec] sm:$0xf0]  ;;  %v3074_v40 = vor.u32 %v3696_v29, %v3073_v28  ;;  %1598 = vmatpush.bf16.msra.mxu2 %v2706_v36 }
  0x41   :  { %v3329_v33 = vld [vmem:[#allocation11 + $0x6e0] sm:$0xf]  ;;  %v3760_v34 = vld [vmem:[#allocation11 + $0x6ec] sm:$0xf0]  ;;  %v3202_v43 = vor.u32 %v3728_v32, %v3201_v30  ;;  %1611 = vmatpush.bf16.msra.mxu3 %v2834_v39  ;;  %v2518_v32 = vor.u32 %v3554_v13, %v2515_v15  ;;  %v3550_v39 = vld [vmem:[#allocation11 + $0x64] sm:$0xf] }
  0x42   :  { %v3057_v41 = vld [vmem:[#allocation11 + $0x4c0] sm:$0xf]  ;;  %v3692_v42 = vld [vmem:[#allocation11 + $0x4cc] sm:$0xf0]  ;;  %v3330_v44 = vor.u32 %v3760_v34, %v3329_v33  ;;  %1617 = vmatpush.bf16.msrb.mxu0 %v3074_v40  ;;  %v2499_v40 = vld [vmem:[#allocation11 + $0x70] sm:$0xf0] }
  0x43   :  { %v3185_v45 = vld [vmem:[#allocation11 + $0x5c0] sm:$0xf]  ;;  %v3724_v46 = vld [vmem:[#allocation11 + $0x5cc] sm:$0xf0]  ;;  %v3058_v57 = vor.u32 %v3692_v42, %v3057_v41  ;;  %1630 = vmatpush.bf16.msrb.mxu1 %v3202_v43 }
  0x44   :  { %v3313_v47 = vld [vmem:[#allocation11 + $0x6c0] sm:$0xf]  ;;  %v3756_v49 = vld [vmem:[#allocation11 + $0x6cc] sm:$0xf0]  ;;  %1643 = vmatpush.bf16.msrb.mxu2 %v3330_v44  ;;  %v3186_v60 = vor.u32 %v3724_v46, %v3185_v45 }
  0x45   :  { %v3041_v52 = vld [vmem:[#allocation11 + $0x4a0] sm:$0xf]  ;;  %v3688_v53 = vld [vmem:[#allocation11 + $0x4ac] sm:$0xf0]  ;;  %v3314_v61 = vor.u32 %v3756_v49, %v3313_v47  ;;  %1656 = vmatpush.bf16.msrb.mxu3 %v2566_v48 }
  0x46   :  { %v141_v55 = vld [vmem:[#allocation3] sm:$0xff]  ;;  %v3169_v58 = vld [vmem:[#allocation11 + $0x5a0] sm:$0xf]  ;;  %1618 = vmatpush.bf16.msrb.mxu0 %v3058_v57  ;;  %v3042_v5 = vor.u32 %v3688_v53, %v3041_v52  ;;  %v2502_v53 = vor.u32 %v3550_v39, %v2499_v40 }
  0x47   :  { %v3720_v59 = vld [vmem:[#allocation11 + $0x5ac] sm:$0xf0]  ;;  %v3297_v62 = vld [vmem:[#allocation11 + $0x6a0] sm:$0xf]  ;;  %145 = vst [vmem:[#allocation1] ss:$4 sm:$0xff] %v141_v55  ;;  %1631 = vmatpush.bf16.msrb.mxu1 %v3186_v60 }
  0x48   :  { %v3752_v63 = vld [vmem:[#allocation11 + $0x6ac] sm:$0xf0]  ;;  %v3025_v3 = vld [vmem:[#allocation11 + $0x480] sm:$0xf]  ;;  %1644 = vmatpush.bf16.msrb.mxu2 %v3314_v61  ;;  %v3170_v9 = vor.u32 %v3720_v59, %v3169_v58  ;;  %v3546_v58 = vld [vmem:[#allocation11 + $0x44] sm:$0xf] }
  0x49   :  { %v3684_v4 = vld [vmem:[#allocation11 + $0x48c] sm:$0xf0]  ;;  %v3153_v6 = vld [vmem:[#allocation11 + $0x580] sm:$0xf]  ;;  %v3298_v10 = vor.u32 %v3752_v63, %v3297_v62  ;;  %1657 = vmatpush.bf16.msrb.mxu3 %v2550_v0  ;;  %v2483_v59 = vld [vmem:[#allocation11 + $0x50] sm:$0xf0] }
  0x4a   :  { %v3716_v7 = vld [vmem:[#allocation11 + $0x58c] sm:$0xf0]  ;;  %v3281_v8 = vld [vmem:[#allocation11 + $0x680] sm:$0xf]  ;;  %1619 = vmatpush.bf16.msrb.mxu0 %v3042_v5  ;;  %v3026_v21 = vor.u32 %v3684_v4, %v3025_v3  ;;  %v2486_v5 = vor.u32 %v3546_v58, %v2483_v59  ;;  %v2803_v40 = vld [vmem:[#allocation11 + $0x2d0] sm:$0xf0] }
  0x4b   :  { %v3748_v12 = vld [vmem:[#allocation11 + $0x68c] sm:$0xf0]  ;;  %v3009_v17 = vld [vmem:[#allocation11 + $0x460] sm:$0xf]  ;;  %1632 = vmatpush.bf16.msrb.mxu1 %v3170_v9  ;;  %v3154_v27 = vor.u32 %v3716_v7, %v3153_v6  ;;  %v2467_v9 = vld [vmem:[#allocation11 + $0x30] sm:$0xf0] }
  0x4c   :  { %v189_v16 = vld [vmem:[#allocation16] sm:$0x3]  ;;  %v3137_v19 = vld [vmem:[#allocation11 + $0x560] sm:$0xf]  ;;  %1645 = vmatpush.bf16.msrb.mxu2 %v3298_v10  ;;  %v3282_v28 = vor.u32 %v3748_v12, %v3281_v8  ;;  %v3542_v8 = vld [vmem:[#allocation11 + $0x24] sm:$0xf] }
  0x4d   :  { %v3680_v18 = vld [vmem:[#allocation11 + $0x46c] sm:$0xf0]  ;;  %v191_v24 = vadd.f32 %v190_v14, %v189_v16  ;;  %v3265_v25 = vld [vmem:[#allocation11 + $0x660] sm:$0xf]  ;;  %1658 = vmatpush.bf16.msrb.mxu3 %v2534_v11  ;;  %v2470_v16 = vor.u32 %v3542_v8, %v2467_v9  ;;  %v2787_v58 = vld [vmem:[#allocation11 + $0x2b0] sm:$0xf0] }
  0x4e   :  { %v3712_v20 = vld [vmem:[#allocation11 + $0x56c] sm:$0xf0]  ;;  %v148_v22 = vld.sshfl [vmem:[#allocation1] sm:$0xff pattern:$0x73625140]  ;;  %1620 = vmatpush.bf16.msrb.mxu0 %v3026_v21  ;;  %v3010_v43 = vor.u32 %v3680_v18, %v3009_v17 }
  0x4f   :  { %v149_v23 = vld.sshfl [vmem:[#allocation1 + $0x8] sm:$0xff pattern:$0x73625140]  ;;  %v3744_v26 = vld [vmem:[#allocation11 + $0x66c] sm:$0xf0]  ;;  %v192_v36 = vpack.c.bf16 %v191_v24, %v191_v24  ;;  %v3138_v44 = vor.u32 %v3712_v20, %v3137_v19  ;;  %1633 = vmatpush.bf16.msrb.mxu1 %v3154_v27 }
  0x50   :  { %v150_v29 = vld.sshfl [vmem:[#allocation1 + $0x10] sm:$0xff pattern:$0x73625140]  ;;  %v151_v30 = vld.sshfl [vmem:[#allocation1 + $0x18] sm:$0xff pattern:$0x73625140]  ;;  %v160_v31 = vpack.c.bf16 %v149_v23, %v148_v22  ;;  %1646 = vmatpush.bf16.msrb.mxu2 %v3282_v28  ;;  %v3266_v49 = vor.u32 %v3744_v26, %v3265_v25 }
  0x51   :  { %v152_v33 = vld.sshfl [vmem:[#allocation1 + $0x20] sm:$0xff pattern:$0x73625140]  ;;  %v153_v34 = vld.sshfl [vmem:[#allocation1 + $0x28] sm:$0xff pattern:$0x73625140]  ;;  %v161_v35 = vpack.c.bf16 %v151_v30, %v150_v29  ;;  %1659 = vmatpush.bf16.msrb.mxu3 %v2518_v32 }
  0x52   :  { %v162_v37 = vpack.c.bf16 %v153_v34, %v152_v33  ;;  %v166_v38 = vrot.slane %v160_v31, 3  ;;  %193 = vst [vmem:[#allocation2 + $0x6] sm:$0x1] %v192_v36  ;;  %v2993_v45 = vld [vmem:[#allocation11 + $0x440] sm:$0xf]  ;;  %1621 = vmatpush.bf16.msrb.mxu0 %v3010_v43 }
  0x53   :  { %v167_v41 = vrot.slane %v161_v35, 6  ;;  %v168_v42 = vrot.slane %v161_v35, 1  ;;  %v3676_v50 = vld [vmem:[#allocation11 + $0x44c] sm:$0xf0]  ;;  %v3121_v51 = vld [vmem:[#allocation11 + $0x540] sm:$0xf]  ;;  %1634 = vmatpush.bf16.msrb.mxu1 %v3138_v44 }
  0x54   :  { %v169_v46 = vrot.slane %v162_v37, 4  ;;  %v170_v47 = vrot.slane %v162_v37, 7  ;;  %v174_v48 = vsel %vm171_vm0, %v160_v31, %v166_v38  ;;  %v3708_v54 = vld [vmem:[#allocation11 + $0x54c] sm:$0xf0]  ;;  %v3249_v55 = vld [vmem:[#allocation11 + $0x640] sm:$0xf]  ;;  %v2994_v61 = vor.u32 %v3676_v50, %v2993_v45  ;;  %1647 = vmatpush.bf16.msrb.mxu2 %v3266_v49 }
  0x55   :  { %v177_v52 = vsel %vm175_vm1, %v174_v48, %v167_v41  ;;  %v3740_v56 = vld [vmem:[#allocation11 + $0x64c] sm:$0xf0]  ;;  %v2977_v62 = vld [vmem:[#allocation11 + $0x420] sm:$0xf]  ;;  %v3122_v0 = vor.u32 %v3708_v54, %v3121_v51  ;;  %1660 = vmatpush.bf16.msrb.mxu3 %v2502_v53  ;;  %v3538_v20 = vld [vmem:[#allocation11 + $0x4] sm:$0xf] }
  0x56   :  { %v181_v57 = vsel %vm178_vm2, %v168_v42, %v169_v46  ;;  %v3250_v1 = vor.u32 %v3740_v56, %v3249_v55  ;;  %v3672_v2 = vld [vmem:[#allocation11 + $0x42c] sm:$0xf0]  ;;  %v3105_v3 = vld [vmem:[#allocation11 + $0x520] sm:$0xf]  ;;  %1622 = vmatpush.bf16.msrb.mxu0 %v2994_v61  ;;  %v2451_v21 = vld [vmem:[#allocation11 + $0x10] sm:$0xf0] }
  0x57   :  { %v184_v60 = vsel %vm182_vm3, %v181_v57, %v170_v47  ;;  %v3704_v4 = vld [vmem:[#allocation11 + $0x52c] sm:$0xf0]  ;;  %v3233_v6 = vld [vmem:[#allocation11 + $0x620] sm:$0xf]  ;;  %v2978_v10 = vor.u32 %v3672_v2, %v2977_v62  ;;  %1635 = vmatpush.bf16.msrb.mxu1 %v3122_v0  ;;  %v2454_v26 = vor.u32 %v3538_v20, %v2451_v21  ;;  %v3598_v27 = vld [vmem:[#allocation11 + $0x1e4] sm:$0xf] }
  0x58   :  { %v186_v63 = vsel %vm185_vm4, %v177_v52, %v184_v60  ;;  %v3736_v7 = vld [vmem:[#allocation11 + $0x62c] sm:$0xf0]  ;;  %1648 = vmatpush.bf16.msrb.mxu2 %v3250_v1  ;;  %v3106_v11 = vor.u32 %v3704_v4, %v3105_v3  ;;  %v2961_v13 = vld [vmem:[#allocation11 + $0x400] sm:$0xf]  ;;  %v2691_v28 = vld [vmem:[#allocation11 + $0x1f0] sm:$0xf0] }
  0x59   :  { %188 = vst [vmem:[#allocation2] sm:$0x3f] %v186_v63  ;;  %v3234_v12 = vor.u32 %v3736_v7, %v3233_v6  ;;  %v3668_v14 = vld [vmem:[#allocation11 + $0x40c] sm:$0xf0]  ;;  %v3089_v15 = vld [vmem:[#allocation11 + $0x500] sm:$0xf]  ;;  %1661 = vmatpush.bf16.msrb.mxu3 %v2486_v5  ;;  %v2694_v38 = vor.u32 %v3598_v27, %v2691_v28 }
  0x5a   :  { %v3700_v17 = vld [vmem:[#allocation11 + $0x50c] sm:$0xf0]  ;;  %v3217_v18 = vld [vmem:[#allocation11 + $0x600] sm:$0xf]  ;;  %1623 = vmatpush.bf16.msrb.mxu0 %v2978_v10  ;;  %v2962_v22 = vor.u32 %v3668_v14, %v2961_v13  ;;  %v3630_v29 = vld [vmem:[#allocation11 + $0x2e4] sm:$0xf] }
  0x5b   :  { %v3732_v19 = vld [vmem:[#allocation11 + $0x60c] sm:$0xf0]  ;;  %1636 = vmatpush.bf16.msrb.mxu1 %v3106_v11  ;;  %v3090_v24 = vor.u32 %v3700_v17, %v3089_v15  ;;  %v2819_v30 = vld [vmem:[#allocation11 + $0x2f0] sm:$0xf0]  ;;  %v3662_v31 = vld [vmem:[#allocation11 + $0x3e4] sm:$0xf] }
  0x5c   :  { %1649 = vmatpush.bf16.msrb.mxu2 %v3234_v12  ;;  %v3218_v25 = vor.u32 %v3732_v19, %v3217_v18  ;;  %v2947_v32 = vld [vmem:[#allocation11 + $0x3f0] sm:$0xf0]  ;;  %v3694_v33 = vld [vmem:[#allocation11 + $0x4e4] sm:$0xf]  ;;  %v2822_v39 = vor.u32 %v3630_v29, %v2819_v30  ;;  %vm2387_vm2 = vcmask 1045508   ;;  %vm2389_vm3 = vcmask 1043456  }
  0x5d   :  { %1662 = vmatpush.bf16.msrb.mxu3 %v2470_v16  ;;  %v3075_v34 = vld [vmem:[#allocation11 + $0x4f0] sm:$0xf0]  ;;  %v3594_v35 = vld [vmem:[#allocation11 + $0x1c4] sm:$0xf]  ;;  %v2950_v46 = vor.u32 %v3662_v31, %v2947_v32 }
  0x5e   :  { %1624 = vmatpush.bf16.msrb.mxu0 %v2962_v22  ;;  %v2675_v36 = vld [vmem:[#allocation11 + $0x1d0] sm:$0xf0]  ;;  %v3626_v37 = vld [vmem:[#allocation11 + $0x2c4] sm:$0xf]  ;;  %v3078_v47 = vor.u32 %v3694_v33, %v3075_v34 }
  0x5f   :  { %1637 = vmatpush.bf16.msrb.mxu1 %v3090_v24  ;;  %v3658_v41 = vld [vmem:[#allocation11 + $0x3c4] sm:$0xf]  ;;  %v2931_v42 = vld [vmem:[#allocation11 + $0x3d0] sm:$0xf0]  ;;  %v2678_v51 = vor.u32 %v3594_v35, %v2675_v36  ;;  %v2806_v52 = vor.u32 %v3626_v37, %v2803_v40 }
  0x60   :  { %v194_v23 = vld [vmem:[#allocation2] sm:$0x7f]  ;;  %1650 = vmatpush.bf16.msrb.mxu2 %v3218_v25  ;;  %v3059_v50 = vld [vmem:[#allocation11 + $0x4d0] sm:$0xf0]  ;;  %v2934_v55 = vor.u32 %v3658_v41, %v2931_v42 }
  0x61   :  { %430 = vst [vmem:[#allocation1] ss:$9 sm:$0xff] %v194_v23  ;;  %1663 = vmatpush.bf16.msrb.mxu3 %v2454_v26  ;;  %v3690_v49 = vld [vmem:[#allocation11 + $0x4c4] sm:$0xf]  ;;  %v2659_v54 = vld [vmem:[#allocation11 + $0x1b0] sm:$0xf0] }
  0x62   :  { %v3590_v53 = vld [vmem:[#allocation11 + $0x1a4] sm:$0xf]  ;;  %v3062_v56 = vor.u32 %v3690_v49, %v3059_v50  ;;  %v2915_v60 = vld [vmem:[#allocation11 + $0x3b0] sm:$0xf0] }
  0x63   :  { %v3622_v57 = vld [vmem:[#allocation11 + $0x2a4] sm:$0xf]  ;;  %v3043_v62 = vld [vmem:[#allocation11 + $0x4b0] sm:$0xf0]  ;;  %v2662_v63 = vor.u32 %v3590_v53, %v2659_v54 }
  0x64   :  { %v3654_v59 = vld [vmem:[#allocation11 + $0x3a4] sm:$0xf]  ;;  %v2790_v0 = vor.u32 %v3622_v57, %v2787_v58  ;;  %v2643_v2 = vld [vmem:[#allocation11 + $0x190] sm:$0xf0] }
  0x65   :  { %v3686_v61 = vld [vmem:[#allocation11 + $0x4a4] sm:$0xf]  ;;  %v2918_v3 = vor.u32 %v3654_v59, %v2915_v60  ;;  %v2771_v6 = vld [vmem:[#allocation11 + $0x290] sm:$0xf0] }
  0x66   :  { %v3586_v1 = vld [vmem:[#allocation11 + $0x184] sm:$0xf]  ;;  %v3046_v4 = vor.u32 %v3686_v61, %v3043_v62  ;;  %v2899_v8 = vld [vmem:[#allocation11 + $0x390] sm:$0xf0] }
  0x67   :  { %v3618_v5 = vld [vmem:[#allocation11 + $0x284] sm:$0xf]  ;;  %v3027_v10 = vld [vmem:[#allocation11 + $0x490] sm:$0xf0]  ;;  %v2646_v11 = vor.u32 %v3586_v1, %v2643_v2 }
  0x68   :  { %v4194_v43 = vld [vmem:[#allocation1 + $0x12] sm:$0xff]  ;;  %v4196_v44 = vld [vmem:[#allocation1] sm:$0xff]  ;;  %v4198_v45 = vld [vmem:[#allocation1 + $0x9] sm:$0xff]  ;;  %v2774_v12 = vor.u32 %v3618_v5, %v2771_v6 }
  0x69   :  { %1599 = vmatmul.bf16.vlgmr.msra.gmra.mxu2 %v4194_v43  ;;  %1573 = vmatmul.bf16.vlgmr.msra.gmra.mxu0 %v4196_v44  ;;  %v4202_v48 = vld [vmem:[#allocation1 + $0x1b] sm:$0xff]  ;;  %v3650_v7 = vld [vmem:[#allocation11 + $0x384] sm:$0xf]  ;;  %v2627_v14 = vld [vmem:[#allocation11 + $0x170] sm:$0xf0] }
  0x6a   :  { %1586 = vmatmul.bf16.vlgmr.msra.gmra.mxu1 %v4198_v45  ;;  %1612 = vmatmul.bf16.vlgmr.msra.gmra.mxu3 %v4202_v48  ;;  %v3682_v9 = vld [vmem:[#allocation11 + $0x484] sm:$0xf]  ;;  %v2902_v15 = vor.u32 %v3650_v7, %v2899_v8  ;;  %v2755_v18 = vld [vmem:[#allocation11 + $0x270] sm:$0xf0]  ;;  %v4210_v25 = vld [vmem:[#allocation1 + $0x2d] sm:$0xff] }
  0x6b   :  { %1669 = vmatpush.bf16.msra.mxu0 %v2694_v38  ;;  %1682 = vmatpush.bf16.msra.mxu1 %v2822_v39  ;;  %v3582_v13 = vld [vmem:[#allocation11 + $0x164] sm:$0xf]  ;;  %v3030_v16 = vor.u32 %v3682_v9, %v3027_v10  ;;  %v2883_v20 = vld [vmem:[#allocation11 + $0x370] sm:$0xf0]  ;;  %v2569_v6 = vld [vmem:[#allocation11 + $0xe8] sm:$0xf] }
  0x6c   :  { %1695 = vmatpush.bf16.msra.mxu2 %v2950_v46  ;;  %1708 = vmatpush.bf16.msra.mxu3 %v3078_v47  ;;  %v3614_v17 = vld [vmem:[#allocation11 + $0x264] sm:$0xf]  ;;  %v3011_v22 = vld [vmem:[#allocation11 + $0x470] sm:$0xf0]  ;;  %v2630_v26 = vor.u32 %v3582_v13, %v2627_v14  ;;  %v3569_v9 = vld [vmem:[#allocation11 + $0xf4] sm:$0xf0] }
  0x6d   :  { %v3646_v19 = vld [vmem:[#allocation11 + $0x364] sm:$0xf]  ;;  %v4206_v23 = vld [vmem:[#allocation1 + $0x36] sm:$0xff]  ;;  %v2758_v27 = vor.u32 %v3614_v17, %v2755_v18  ;;  %v2697_v10 = vld [vmem:[#allocation11 + $0x1e8] sm:$0xf]  ;;  %v2570_v18 = vor.u32 %v3569_v9, %v2569_v6 }
  0x6e   :  { %v3678_v21 = vld [vmem:[#allocation11 + $0x464] sm:$0xf]  ;;  %v2611_v29 = vld [vmem:[#allocation11 + $0x150] sm:$0xf0]  ;;  %v2886_v30 = vor.u32 %v3646_v19, %v2883_v20 }
  0x6f   :  { %1670 = vmatpush.bf16.msra.mxu0 %v2678_v51  ;;  %1683 = vmatpush.bf16.msra.mxu1 %v2806_v52  ;;  %v4208_v24 = vld [vmem:[#allocation1 + $0x24] sm:$0xff]  ;;  %v3014_v31 = vor.u32 %v3678_v21, %v3011_v22  ;;  %v2739_v33 = vld [vmem:[#allocation11 + $0x250] sm:$0xf0] }
  0x70   :  { %1696 = vmatpush.bf16.msra.mxu2 %v2934_v55  ;;  %1709 = vmatpush.bf16.msra.mxu3 %v3062_v56  ;;  %v3578_v28 = vld [vmem:[#allocation11 + $0x144] sm:$0xf]  ;;  %v2867_v35 = vld [vmem:[#allocation11 + $0x350] sm:$0xf0]  ;;  %v2553_v22 = vld [vmem:[#allocation11 + $0xc8] sm:$0xf] }
  0x71   :  { %v3610_v32 = vld [vmem:[#allocation11 + $0x244] sm:$0xf]  ;;  %v2995_v37 = vld [vmem:[#allocation11 + $0x450] sm:$0xf0]  ;;  %v2614_v38 = vor.u32 %v3578_v28, %v2611_v29  ;;  %v3597_v28 = vld [vmem:[#allocation11 + $0x1d4] sm:$0xf0] }
  0x72   :  { %v3642_v34 = vld [vmem:[#allocation11 + $0x344] sm:$0xf]  ;;  %v2742_v39 = vor.u32 %v3610_v32, %v2739_v33  ;;  %v2595_v41 = vld [vmem:[#allocation11 + $0x130] sm:$0xf0] }
  0x73   :  { %1671 = vmatpush.bf16.msra.mxu0 %v2662_v63  ;;  %1684 = vmatpush.bf16.msra.mxu1 %v2790_v0  ;;  %v3674_v36 = vld [vmem:[#allocation11 + $0x444] sm:$0xf]  ;;  %v2870_v42 = vor.u32 %v3642_v34, %v2867_v35  ;;  %v2723_v49 = vld [vmem:[#allocation11 + $0x230] sm:$0xf0] }
  0x74   :  { %1697 = vmatpush.bf16.msra.mxu2 %v2918_v3  ;;  %1710 = vmatpush.bf16.msra.mxu3 %v3046_v4  ;;  %v3574_v40 = vld [vmem:[#allocation11 + $0x124] sm:$0xf]  ;;  %v2998_v46 = vor.u32 %v3674_v36, %v2995_v37  ;;  %v2851_v51 = vld [vmem:[#allocation11 + $0x330] sm:$0xf0]  ;;  %v2537_v37 = vld [vmem:[#allocation11 + $0xa8] sm:$0xf] }
  0x75   :  { %v3606_v47 = vld [vmem:[#allocation11 + $0x224] sm:$0xf]  ;;  %v2979_v53 = vld [vmem:[#allocation11 + $0x430] sm:$0xf0]  ;;  %v2598_v55 = vor.u32 %v3574_v40, %v2595_v41  ;;  %v3593_v40 = vld [vmem:[#allocation11 + $0x1b4] sm:$0xf0] }
  0x76   :  { %v3638_v50 = vld [vmem:[#allocation11 + $0x324] sm:$0xf]  ;;  %v2726_v56 = vor.u32 %v3606_v47, %v2723_v49  ;;  %v2579_v57 = vld [vmem:[#allocation11 + $0x110] sm:$0xf0] }
  0x77   :  { %1672 = vmatpush.bf16.msra.mxu0 %v2646_v11  ;;  %1685 = vmatpush.bf16.msra.mxu1 %v2774_v12  ;;  %v3670_v52 = vld [vmem:[#allocation11 + $0x424] sm:$0xf]  ;;  %v2707_v59 = vld [vmem:[#allocation11 + $0x210] sm:$0xf0]  ;;  %v2854_v60 = vor.u32 %v3638_v50, %v2851_v51  ;;  %v3601_v11 = vld [vmem:[#allocation11 + $0x1f4] sm:$0xf0] }
  0x78   :  { %1698 = vmatpush.bf16.msra.mxu2 %v2902_v15  ;;  %1711 = vmatpush.bf16.msra.mxu3 %v3030_v16  ;;  %v3570_v54 = vld [vmem:[#allocation11 + $0x104] sm:$0xf]  ;;  %v2982_v61 = vor.u32 %v3670_v52, %v2979_v53  ;;  %v2835_v63 = vld [vmem:[#allocation11 + $0x310] sm:$0xf0]  ;;  %v2698_v19 = vor.u32 %v3601_v11, %v2697_v10  ;;  %v2521_v53 = vld [vmem:[#allocation11 + $0x88] sm:$0xf] }
  0x79   :  { %1651 = vmatmul.bf16.vlgmr.msrb.gmra.mxu2 %v4206_v23  ;;  %1625 = vmatmul.bf16.vlgmr.msrb.gmra.mxu0 %v4208_v24  ;;  %v3602_v58 = vld [vmem:[#allocation11 + $0x204] sm:$0xf]  ;;  %v2963_v1 = vld [vmem:[#allocation11 + $0x410] sm:$0xf0]  ;;  %v2582_v7 = vor.u32 %v3570_v54, %v2579_v57  ;;  %v3557_v54 = vld [vmem:[#allocation11 + $0x94] sm:$0xf0] }
  0x7a   :  { %1638 = vmatmul.bf16.vlgmr.msrb.gmra.mxu1 %v4210_v25  ;;  %1664 = vmatmul.bf16.vlgmr.msrb.gmra.mxu3 %v4196_v44  ;;  %v3634_v62 = vld [vmem:[#allocation11 + $0x304] sm:$0xf]  ;;  %v3203_v3 = vld [vmem:[#allocation11 + $0x5f0] sm:$0xf0]  ;;  %v2710_v8 = vor.u32 %v3602_v58, %v2707_v59 }
  0x7b   :  { %1673 = vmatpush.bf16.msra.mxu0 %v2630_v26  ;;  %1686 = vmatpush.bf16.msra.mxu1 %v2758_v27  ;;  %v3666_v0 = vld [vmem:[#allocation11 + $0x404] sm:$0xf]  ;;  %v3331_v5 = vld [vmem:[#allocation11 + $0x6f0] sm:$0xf0]  ;;  %v2838_v12 = vor.u32 %v3634_v62, %v2835_v63  ;;  %v3565_v26 = vld [vmem:[#allocation11 + $0xd4] sm:$0xf0] }
  0x7c   :  { %1699 = vmatpush.bf16.msra.mxu2 %v2886_v30  ;;  %1712 = vmatpush.bf16.msra.mxu3 %v3014_v31  ;;  %v3726_v2 = vld [vmem:[#allocation11 + $0x5e4] sm:$0xf]  ;;  %v2966_v13 = vor.u32 %v3666_v0, %v2963_v1  ;;  %v3187_v17 = vld [vmem:[#allocation11 + $0x5d0] sm:$0xf0]  ;;  %v2681_v27 = vld [vmem:[#allocation11 + $0x1c8] sm:$0xf]  ;;  %v2554_v33 = vor.u32 %v3565_v26, %v2553_v22 }
  0x7d   :  { %v3758_v4 = vld [vmem:[#allocation11 + $0x6e4] sm:$0xf]  ;;  %v3206_v14 = vor.u32 %v3726_v2, %v3203_v3  ;;  %v3315_v21 = vld [vmem:[#allocation11 + $0x6d0] sm:$0xf0]  ;;  %v2682_v34 = vor.u32 %v3597_v28, %v2681_v27  ;;  %v2505_v1 = vld [vmem:[#allocation11 + $0x68] sm:$0xf] }
  0x7e   :  { %v3334_v15 = vor.u32 %v3758_v4, %v3331_v5  ;;  %v3722_v16 = vld [vmem:[#allocation11 + $0x5c4] sm:$0xf]  ;;  %v3171_v32 = vld [vmem:[#allocation11 + $0x5b0] sm:$0xf0]  ;;  %v3553_v2 = vld [vmem:[#allocation11 + $0x74] sm:$0xf0] }
  0x7f   :  { %1674 = vmatpush.bf16.msra.mxu0 %v2614_v38  ;;  %1687 = vmatpush.bf16.msra.mxu1 %v2742_v39  ;;  %v3754_v20 = vld [vmem:[#allocation11 + $0x6c4] sm:$0xf]  ;;  %v3190_v29 = vor.u32 %v3722_v16, %v3187_v17  ;;  %v3299_v36 = vld [vmem:[#allocation11 + $0x6b0] sm:$0xf0]  ;;  %v3561_v38 = vld [vmem:[#allocation11 + $0xb4] sm:$0xf0]  ;;  %v2506_v9 = vor.u32 %v3553_v2, %v2505_v1 }
  0x80   :  { %1700 = vmatpush.bf16.msra.mxu2 %v2870_v42  ;;  %1713 = vmatpush.bf16.msra.mxu3 %v2998_v46  ;;  %v3318_v30 = vor.u32 %v3754_v20, %v3315_v21  ;;  %v3718_v31 = vld [vmem:[#allocation11 + $0x5a4] sm:$0xf]  ;;  %v2665_v39 = vld [vmem:[#allocation11 + $0x1a8] sm:$0xf]  ;;  %v3155_v47 = vld [vmem:[#allocation11 + $0x590] sm:$0xf0]  ;;  %v2538_v49 = vor.u32 %v3561_v38, %v2537_v37 }
  0x81   :  { %v3750_v35 = vld [vmem:[#allocation11 + $0x6a4] sm:$0xf]  ;;  %v3174_v41 = vor.u32 %v3718_v31, %v3171_v32  ;;  %v2666_v50 = vor.u32 %v3593_v40, %v2665_v39  ;;  %v3283_v52 = vld [vmem:[#allocation11 + $0x690] sm:$0xf0]  ;;  %v2633_v3 = vld [vmem:[#allocation11 + $0x168] sm:$0xf] }
  0x82   :  { %v3302_v42 = vor.u32 %v3750_v35, %v3299_v36  ;;  %v3714_v46 = vld [vmem:[#allocation11 + $0x584] sm:$0xf]  ;;  %v3267_v0 = vld [vmem:[#allocation11 + $0x670] sm:$0xf0]  ;;  %v3585_v4 = vld [vmem:[#allocation11 + $0x174] sm:$0xf0] }
  0x83   :  { %1675 = vmatpush.bf16.msra.mxu0 %v2598_v55  ;;  %1688 = vmatpush.bf16.msra.mxu1 %v2726_v56  ;;  %v3746_v51 = vld [vmem:[#allocation11 + $0x684] sm:$0xf]  ;;  %v2649_v55 = vld [vmem:[#allocation11 + $0x188] sm:$0xf]  ;;  %v3589_v56 = vld [vmem:[#allocation11 + $0x194] sm:$0xf0]  ;;  %v3158_v57 = vor.u32 %v3714_v46, %v3155_v47  ;;  %v2634_v10 = vor.u32 %v3585_v4, %v2633_v3 }
  0x84   :  { %1701 = vmatpush.bf16.msra.mxu2 %v2854_v60  ;;  %1714 = vmatpush.bf16.msra.mxu3 %v2982_v61  ;;  %v3286_v58 = vor.u32 %v3746_v51, %v3283_v52  ;;  %v3710_v59 = vld [vmem:[#allocation11 + $0x564] sm:$0xf]  ;;  %v3139_v60 = vld [vmem:[#allocation11 + $0x570] sm:$0xf0]  ;;  %v2522_v61 = vor.u32 %v3557_v54, %v2521_v53  ;;  %v2650_v62 = vor.u32 %v3589_v56, %v2649_v55  ;;  %v3581_v16 = vld [vmem:[#allocation11 + $0x154] sm:$0xf0] }
  0x85   :  { %v3742_v63 = vld [vmem:[#allocation11 + $0x664] sm:$0xf]  ;;  %v3142_v5 = vor.u32 %v3710_v59, %v3139_v60  ;;  %v3107_v20 = vld [vmem:[#allocation11 + $0x530] sm:$0xf0]  ;;  %v2473_v28 = vld [vmem:[#allocation11 + $0x28] sm:$0xf] }
  0x86   :  { %v3270_v6 = vor.u32 %v3742_v63, %v3267_v0  ;;  %v3738_v11 = vld [vmem:[#allocation11 + $0x644] sm:$0xf]  ;;  %v3235_v27 = vld [vmem:[#allocation11 + $0x630] sm:$0xf0]  ;;  %v3577_v31 = vld [vmem:[#allocation11 + $0x134] sm:$0xf0] }
  0x87   :  { %1676 = vmatpush.bf16.msra.mxu0 %v2582_v7  ;;  %1689 = vmatpush.bf16.msra.mxu1 %v2710_v8  ;;  %v3706_v7 = vld [vmem:[#allocation11 + $0x544] sm:$0xf]  ;;  %v3123_v8 = vld [vmem:[#allocation11 + $0x550] sm:$0xf0]  ;;  %v2457_v40 = vld [vmem:[#allocation11 + $0x8] sm:$0xf] }
  0x88   :  { %1702 = vmatpush.bf16.msra.mxu2 %v2838_v12  ;;  %1715 = vmatpush.bf16.msra.mxu3 %v2966_v13  ;;  %v3251_v12 = vld [vmem:[#allocation11 + $0x650] sm:$0xf0]  ;;  %v2489_v13 = vld [vmem:[#allocation11 + $0x48] sm:$0xf]  ;;  %v3126_v17 = vor.u32 %v3706_v7, %v3123_v8  ;;  %v3734_v26 = vld [vmem:[#allocation11 + $0x624] sm:$0xf] }
  0x89   :  { %v3698_v32 = vld [vmem:[#allocation11 + $0x504] sm:$0xf]  ;;  %v3091_v35 = vld [vmem:[#allocation11 + $0x510] sm:$0xf0]  ;;  %v3573_v46 = vld [vmem:[#allocation11 + $0x114] sm:$0xf0] }
  0x8a   :  { %1677 = vmatmul.bf16.vlgmr.msra.gmra.mxu0 %v4198_v45  ;;  %1690 = vmatmul.bf16.vlgmr.msra.gmra.mxu1 %v4194_v43  ;;  %v3730_v36 = vld [vmem:[#allocation11 + $0x604] sm:$0xf]  ;;  %v3219_v37 = vld [vmem:[#allocation11 + $0x610] sm:$0xf0]  ;;  %v2825_v47 = vld [vmem:[#allocation11 + $0x2e8] sm:$0xf]  ;;  %v3094_v53 = vor.u32 %v3698_v32, %v3091_v35 }
  0x8b   :  { %1721 = vmatpush.bf16.msrb.mxu0 %v3206_v14  ;;  %1734 = vmatpush.bf16.msrb.mxu1 %v3334_v15  ;;  %v3549_v14 = vld [vmem:[#allocation11 + $0x54] sm:$0xf0]  ;;  %v2617_v15 = vld [vmem:[#allocation11 + $0x148] sm:$0xf]  ;;  %v3222_v54 = vor.u32 %v3730_v36, %v3219_v37 }
  0x8c   :  { %1747 = vmatpush.bf16.msrb.mxu2 %v2570_v18  ;;  %1760 = vmatpush.bf16.msrb.mxu3 %v2698_v19  ;;  %v3254_v18 = vor.u32 %v3738_v11, %v3251_v12  ;;  %v3702_v19 = vld [vmem:[#allocation11 + $0x524] sm:$0xf]  ;;  %v2490_v21 = vor.u32 %v3549_v14, %v2489_v13  ;;  %v2618_v22 = vor.u32 %v3581_v16, %v2617_v15  ;;  %v3665_v51 = vld [vmem:[#allocation11 + $0x3f4] sm:$0xf0]  ;;  %v3081_v52 = vld [vmem:[#allocation11 + $0x4e8] sm:$0xf] }
  0x8d   :  { %1703 = vmatmul.bf16.vlgmr.msra.gmra.mxu2 %v4202_v48  ;;  %1716 = vmatmul.bf16.vlgmr.msra.gmra.mxu3 %v4208_v24  ;;  %v3697_v55 = vld [vmem:[#allocation11 + $0x4f4] sm:$0xf0]  ;;  %v3209_v56 = vld [vmem:[#allocation11 + $0x5e8] sm:$0xf] }
  0x8e   :  { %v3629_v63 = vld [vmem:[#allocation11 + $0x2d4] sm:$0xf0]  ;;  %v3082_v0 = vor.u32 %v3697_v55, %v3081_v52  ;;  %v2937_v2 = vld [vmem:[#allocation11 + $0x3c8] sm:$0xf] }
  0x8f   :  { %1722 = vmatpush.bf16.msrb.mxu0 %v3190_v29  ;;  %1735 = vmatpush.bf16.msrb.mxu1 %v3318_v30  ;;  %v3545_v29 = vld [vmem:[#allocation11 + $0x34] sm:$0xf0]  ;;  %v2601_v30 = vld [vmem:[#allocation11 + $0x128] sm:$0xf] }
  0x90   :  { %1748 = vmatpush.bf16.msrb.mxu2 %v2554_v33  ;;  %1761 = vmatpush.bf16.msrb.mxu3 %v2682_v34  ;;  %v3110_v33 = vor.u32 %v3702_v19, %v3107_v20  ;;  %v3238_v34 = vor.u32 %v3734_v26, %v3235_v27  ;;  %v2474_v38 = vor.u32 %v3545_v29, %v2473_v28  ;;  %v3661_v3 = vld [vmem:[#allocation11 + $0x3d4] sm:$0xf0]  ;;  %v3065_v4 = vld [vmem:[#allocation11 + $0x4c8] sm:$0xf] }
  0x91   :  { %v2602_v39 = vor.u32 %v3577_v31, %v2601_v30  ;;  %v3725_v7 = vld [vmem:[#allocation11 + $0x5d4] sm:$0xf0]  ;;  %v2921_v14 = vld [vmem:[#allocation11 + $0x3a8] sm:$0xf] }
  0x92   :  { %v3625_v11 = vld [vmem:[#allocation11 + $0x2b4] sm:$0xf0]  ;;  %v3049_v16 = vld [vmem:[#allocation11 + $0x4a8] sm:$0xf] }
  0x93   :  { %1723 = vmatpush.bf16.msrb.mxu0 %v3174_v41  ;;  %1736 = vmatpush.bf16.msrb.mxu1 %v3302_v42  ;;  %v3541_v41 = vld [vmem:[#allocation11 + $0x14] sm:$0xf0]  ;;  %v2585_v42 = vld [vmem:[#allocation11 + $0x108] sm:$0xf] }
  0x94   :  { %1749 = vmatpush.bf16.msrb.mxu2 %v2538_v49  ;;  %1762 = vmatpush.bf16.msrb.mxu3 %v2666_v50  ;;  %v3633_v49 = vld [vmem:[#allocation11 + $0x2f4] sm:$0xf0]  ;;  %v2953_v50 = vld [vmem:[#allocation11 + $0x3e8] sm:$0xf]  ;;  %v2586_v59 = vor.u32 %v3573_v46, %v2585_v42 }
  0x95   :  { %v2826_v60 = vor.u32 %v3633_v49, %v2825_v47  ;;  %v3657_v15 = vld [vmem:[#allocation11 + $0x3b4] sm:$0xf0]  ;;  %v2905_v29 = vld [vmem:[#allocation11 + $0x388] sm:$0xf] }
  0x96   :  { %v3721_v19 = vld [vmem:[#allocation11 + $0x5b4] sm:$0xf0]  ;;  %v3033_v31 = vld [vmem:[#allocation11 + $0x488] sm:$0xf] }
  0x97   :  { %1724 = vmatpush.bf16.msrb.mxu0 %v3158_v57  ;;  %1737 = vmatpush.bf16.msrb.mxu1 %v3286_v58  ;;  %v3729_v57 = vld [vmem:[#allocation11 + $0x5f4] sm:$0xf0]  ;;  %v2458_v58 = vor.u32 %v3541_v41, %v2457_v40  ;;  %v2761_v35 = vld [vmem:[#allocation11 + $0x268] sm:$0xf] }
  0x98   :  { %1750 = vmatpush.bf16.msrb.mxu2 %v2522_v61  ;;  %1763 = vmatpush.bf16.msrb.mxu3 %v2650_v62  ;;  %v2954_v61 = vor.u32 %v3665_v51, %v2953_v50  ;;  %v2809_v62 = vld [vmem:[#allocation11 + $0x2c8] sm:$0xf]  ;;  %v3210_v1 = vor.u32 %v3729_v57, %v3209_v56  ;;  %v3621_v26 = vld [vmem:[#allocation11 + $0x294] sm:$0xf0] }
  0x99   :  { %v2810_v8 = vor.u32 %v3629_v63, %v2809_v62  ;;  %v3653_v30 = vld [vmem:[#allocation11 + $0x394] sm:$0xf0]  ;;  %v3017_v41 = vld [vmem:[#allocation11 + $0x468] sm:$0xf] }
  0x9a   :  { %v3685_v32 = vld [vmem:[#allocation11 + $0x494] sm:$0xf0]  ;;  %v3145_v46 = vld [vmem:[#allocation11 + $0x568] sm:$0xf] }
  0x9b   :  { %1725 = vmatpush.bf16.msrb.mxu0 %v3142_v5  ;;  %1738 = vmatpush.bf16.msrb.mxu1 %v3270_v6  ;;  %v3693_v5 = vld [vmem:[#allocation11 + $0x4d4] sm:$0xf0]  ;;  %v3193_v6 = vld [vmem:[#allocation11 + $0x5c8] sm:$0xf]  ;;  %v3034_v37 = vor.u32 %v3685_v32, %v3033_v31  ;;  %v2699_v31 = vld [vmem:[#allocation11 + $0x1f8] sm:$0xf0] }
  0x9c   :  { %1751 = vmatpush.bf16.msrb.mxu2 %v2506_v9  ;;  %1764 = vmatpush.bf16.msrb.mxu3 %v2634_v10  ;;  %v2938_v9 = vor.u32 %v3661_v3, %v2937_v2  ;;  %v2793_v10 = vld [vmem:[#allocation11 + $0x2a8] sm:$0xf]  ;;  %v3066_v12 = vor.u32 %v3693_v5, %v3065_v4  ;;  %v3194_v13 = vor.u32 %v3725_v7, %v3193_v6  ;;  %v3617_v36 = vld [vmem:[#allocation11 + $0x274] sm:$0xf0]  ;;  %v3631_v32 = vld [vmem:[#allocation11 + $0x2ec] sm:$0xf] }
  0x9d   :  { %v2794_v20 = vor.u32 %v3625_v11, %v2793_v10  ;;  %v3649_v40 = vld [vmem:[#allocation11 + $0x374] sm:$0xf0]  ;;  %v2762_v49 = vor.u32 %v3617_v36, %v2761_v35  ;;  %v2745_v51 = vld [vmem:[#allocation11 + $0x248] sm:$0xf] }
  0x9e   :  { %v3681_v42 = vld [vmem:[#allocation11 + $0x474] sm:$0xf0]  ;;  %v2873_v55 = vld [vmem:[#allocation11 + $0x348] sm:$0xf] }
  0x9f   :  { %1726 = vmatpush.bf16.msrb.mxu0 %v3126_v17  ;;  %1739 = vmatpush.bf16.msrb.mxu1 %v3254_v18  ;;  %v3689_v17 = vld [vmem:[#allocation11 + $0x4b4] sm:$0xf0]  ;;  %v3177_v18 = vld [vmem:[#allocation11 + $0x5a8] sm:$0xf] }
  0xa0   :  { %1752 = vmatpush.bf16.msrb.mxu2 %v2490_v21  ;;  %1765 = vmatpush.bf16.msrb.mxu3 %v2618_v22  ;;  %v2922_v21 = vor.u32 %v3657_v15, %v2921_v14  ;;  %v2777_v22 = vld [vmem:[#allocation11 + $0x288] sm:$0xf]  ;;  %v3050_v27 = vor.u32 %v3689_v17, %v3049_v16  ;;  %v3178_v28 = vor.u32 %v3721_v19, %v3177_v18  ;;  %v3713_v47 = vld [vmem:[#allocation11 + $0x574] sm:$0xf0] }
  0xa1   :  { %v3613_v52 = vld [vmem:[#allocation11 + $0x254] sm:$0xf0]  ;;  %v3001_v57 = vld [vmem:[#allocation11 + $0x448] sm:$0xf] }
  0xa2   :  { %v3645_v56 = vld [vmem:[#allocation11 + $0x354] sm:$0xf0]  ;;  %v2729_v63 = vld [vmem:[#allocation11 + $0x228] sm:$0xf] }
  0xa3   :  { %1727 = vmatpush.bf16.msrb.mxu0 %v3110_v33  ;;  %1740 = vmatpush.bf16.msrb.mxu1 %v3238_v34  ;;  %v3161_v33 = vld [vmem:[#allocation11 + $0x588] sm:$0xf]  ;;  %v3717_v34 = vld [vmem:[#allocation11 + $0x594] sm:$0xf0]  ;;  %v2874_v62 = vor.u32 %v3645_v56, %v2873_v55  ;;  %v3559_v56 = vld [vmem:[#allocation11 + $0xac] sm:$0xf] }
  0xa4   :  { %1753 = vmatpush.bf16.msrb.mxu2 %v2474_v38  ;;  %1766 = vmatpush.bf16.msrb.mxu3 %v2602_v39  ;;  %v3162_v38 = vor.u32 %v3717_v34, %v3161_v33  ;;  %v2889_v39 = vld [vmem:[#allocation11 + $0x368] sm:$0xf]  ;;  %v3641_v4 = vld [vmem:[#allocation11 + $0x334] sm:$0xf0]  ;;  %v2827_v33 = vld [vmem:[#allocation11 + $0x2f8] sm:$0xf0] }
  0xa5   :  { %v2890_v50 = vor.u32 %v3649_v40, %v2889_v39  ;;  %v2857_v3 = vld [vmem:[#allocation11 + $0x328] sm:$0xf]  ;;  %v3673_v6 = vld [vmem:[#allocation11 + $0x434] sm:$0xf0]  ;;  %v2830_v39 = vor.u32 %v3631_v32, %v2827_v33  ;;  %v3563_v40 = vld [vmem:[#allocation11 + $0xcc] sm:$0xf] }
  0xa6   :  { %v2985_v5 = vld [vmem:[#allocation11 + $0x428] sm:$0xf]  ;;  %v2858_v11 = vor.u32 %v3641_v4, %v2857_v3  ;;  %v3637_v14 = vld [vmem:[#allocation11 + $0x314] sm:$0xf0]  ;;  %v2523_v4 = vld [vmem:[#allocation11 + $0x98] sm:$0xf0] }
  0xa7   :  { %1728 = vmatpush.bf16.msrb.mxu0 %v3094_v53  ;;  %1741 = vmatpush.bf16.msrb.mxu1 %v3222_v54  ;;  %v3018_v53 = vor.u32 %v3681_v42, %v3017_v41  ;;  %v3146_v54 = vor.u32 %v3713_v47, %v3145_v46  ;;  %v3113_v7 = vld [vmem:[#allocation11 + $0x528] sm:$0xf]  ;;  %v2986_v15 = vor.u32 %v3673_v6, %v2985_v5  ;;  %v3669_v18 = vld [vmem:[#allocation11 + $0x414] sm:$0xf0]  ;;  %v2555_v41 = vld [vmem:[#allocation11 + $0xd8] sm:$0xf0] }
  0xa8   :  { %1754 = vmatpush.bf16.msrb.mxu2 %v2458_v58  ;;  %1767 = vmatpush.bf16.msrb.mxu3 %v2586_v59  ;;  %v3677_v58 = vld [vmem:[#allocation11 + $0x454] sm:$0xf0]  ;;  %v3129_v59 = vld [vmem:[#allocation11 + $0x548] sm:$0xf]  ;;  %v3595_v42 = vld [vmem:[#allocation11 + $0x1cc] sm:$0xf] }
  0xa9   :  { %v2969_v17 = vld [vmem:[#allocation11 + $0x408] sm:$0xf]  ;;  %v2683_v46 = vld [vmem:[#allocation11 + $0x1d8] sm:$0xf0]  ;;  %v3627_v47 = vld [vmem:[#allocation11 + $0x2cc] sm:$0xf] }
  0xaa   :  { %1729 = vmatmul.bf16.vlgmr.msrb.gmra.mxu0 %v4210_v25  ;;  %1742 = vmatmul.bf16.vlgmr.msrb.gmra.mxu1 %v4206_v23  ;;  %v3097_v19 = vld [vmem:[#allocation11 + $0x508] sm:$0xf]  ;;  %v2970_v34 = vor.u32 %v3669_v18, %v2969_v17  ;;  %v3587_v5 = vld [vmem:[#allocation11 + $0x18c] sm:$0xf]  ;;  %v2651_v6 = vld [vmem:[#allocation11 + $0x198] sm:$0xf0] }
  0xab   :  { %1773 = vmatpush.bf16.msra.mxu0 %v2826_v60  ;;  %1786 = vmatpush.bf16.msra.mxu1 %v2954_v61  ;;  %v3709_v60 = vld [vmem:[#allocation11 + $0x554] sm:$0xf0]  ;;  %v2746_v61 = vor.u32 %v3613_v52, %v2745_v51  ;;  %v3321_v36 = vld [vmem:[#allocation11 + $0x6c8] sm:$0xf]  ;;  %v2558_v51 = vor.u32 %v3563_v40, %v2555_v41  ;;  %v2763_v17 = vld [vmem:[#allocation11 + $0x278] sm:$0xf0] }
  0xac   :  { %1799 = vmatpush.bf16.msra.mxu2 %v3082_v0  ;;  %1812 = vmatpush.bf16.msra.mxu3 %v3210_v1  ;;  %v3609_v0 = vld [vmem:[#allocation11 + $0x234] sm:$0xf0]  ;;  %v3002_v1 = vor.u32 %v3677_v58, %v3001_v57  ;;  %v3130_v2 = vor.u32 %v3709_v60, %v3129_v59  ;;  %v3305_v52 = vld [vmem:[#allocation11 + $0x6a8] sm:$0xf]  ;;  %v2539_v57 = vld [vmem:[#allocation11 + $0xb8] sm:$0xf0] }
  0xad   :  { %1755 = vmatmul.bf16.vlgmr.msrb.gmra.mxu2 %v4196_v44  ;;  %1768 = vmatmul.bf16.vlgmr.msrb.gmra.mxu3 %v4198_v45  ;;  %v2778_v44 = vor.u32 %v3621_v26, %v2777_v22  ;;  %v2906_v45 = vor.u32 %v3653_v30, %v2905_v29  ;;  %v2730_v10 = vor.u32 %v3609_v0, %v2729_v63  ;;  %v3761_v22 = vld [vmem:[#allocation11 + $0x6f4] sm:$0xf0]  ;;  %v3567_v26 = vld [vmem:[#allocation11 + $0xec] sm:$0xf]  ;;  %v2667_v59 = vld [vmem:[#allocation11 + $0x1b8] sm:$0xf0] }
  0xae   :  { %v3591_v58 = vld [vmem:[#allocation11 + $0x1ac] sm:$0xf]  ;;  %v2542_v63 = vor.u32 %v3559_v56, %v2539_v57  ;;  %v3289_v0 = vld [vmem:[#allocation11 + $0x688] sm:$0xf]  ;;  %v2747_v32 = vld [vmem:[#allocation11 + $0x258] sm:$0xf0] }
  0xaf   :  { %1774 = vmatpush.bf16.msra.mxu0 %v2810_v8  ;;  %1787 = vmatpush.bf16.msra.mxu1 %v2938_v9  ;;  %v3705_v8 = vld [vmem:[#allocation11 + $0x534] sm:$0xf0]  ;;  %v2713_v9 = vld [vmem:[#allocation11 + $0x208] sm:$0xf]  ;;  %v3623_v60 = vld [vmem:[#allocation11 + $0x2ac] sm:$0xf] }
  0xb0   :  { %1800 = vmatpush.bf16.msra.mxu2 %v3066_v12  ;;  %1813 = vmatpush.bf16.msra.mxu3 %v3194_v13  ;;  %v3605_v12 = vld [vmem:[#allocation11 + $0x214] sm:$0xf0]  ;;  %v2841_v13 = vld [vmem:[#allocation11 + $0x308] sm:$0xf]  ;;  %v3114_v16 = vor.u32 %v3705_v8, %v3113_v7  ;;  %v3619_v7 = vld [vmem:[#allocation11 + $0x28c] sm:$0xf] }
  0xb1   :  { %v2714_v29 = vor.u32 %v3605_v12, %v2713_v9  ;;  %v2842_v30 = vor.u32 %v3637_v14, %v2841_v13  ;;  %v3273_v8 = vld [vmem:[#allocation11 + $0x668] sm:$0xf]  ;;  %v3745_v9 = vld [vmem:[#allocation11 + $0x674] sm:$0xf0]  ;;  %v3551_v12 = vld [vmem:[#allocation11 + $0x6c] sm:$0xf] }
  0xb2   :  { %v2507_v13 = vld [vmem:[#allocation11 + $0x78] sm:$0xf0]  ;;  %v3583_v14 = vld [vmem:[#allocation11 + $0x16c] sm:$0xf]  ;;  %v3274_v18 = vor.u32 %v3745_v9, %v3273_v8 }
  0xb3   :  { %1775 = vmatpush.bf16.msra.mxu0 %v2794_v20  ;;  %1788 = vmatpush.bf16.msra.mxu1 %v2922_v21  ;;  %v3701_v20 = vld [vmem:[#allocation11 + $0x514] sm:$0xf0]  ;;  %v3337_v21 = vld [vmem:[#allocation11 + $0x6e8] sm:$0xf]  ;;  %v2603_v40 = vld [vmem:[#allocation11 + $0x138] sm:$0xf0] }
  0xb4   :  { %1801 = vmatpush.bf16.msra.mxu2 %v3050_v27  ;;  %1814 = vmatpush.bf16.msra.mxu3 %v3178_v28  ;;  %v2571_v27 = vld [vmem:[#allocation11 + $0xf8] sm:$0xf0]  ;;  %v3599_v28 = vld [vmem:[#allocation11 + $0x1ec] sm:$0xf] }
  0xb5   :  { %v2574_v35 = vor.u32 %v3567_v26, %v2571_v27  ;;  %v3547_v27 = vld [vmem:[#allocation11 + $0x4c] sm:$0xf]  ;;  %v2587_v56 = vld [vmem:[#allocation11 + $0x118] sm:$0xf0] }
  0xb6   :  { %v3607_v41 = vld [vmem:[#allocation11 + $0x22c] sm:$0xf] }
  0xb7   :  { %1776 = vmatpush.bf16.msra.mxu0 %v2778_v44  ;;  %1789 = vmatpush.bf16.msra.mxu1 %v2906_v45  ;;  %v3098_v44 = vor.u32 %v3701_v20, %v3097_v19  ;;  %v3338_v45 = vor.u32 %v3761_v22, %v3337_v21  ;;  %v2510_v19 = vor.u32 %v3551_v12, %v2507_v13  ;;  %v3257_v20 = vld [vmem:[#allocation11 + $0x648] sm:$0xf]  ;;  %v3741_v21 = vld [vmem:[#allocation11 + $0x654] sm:$0xf0]  ;;  %v3603_v57 = vld [vmem:[#allocation11 + $0x20c] sm:$0xf] }
  0xb8   :  { %1802 = vmatpush.bf16.msra.mxu2 %v3034_v37  ;;  %1815 = vmatpush.bf16.msra.mxu3 %v3162_v38  ;;  %v3757_v37 = vld [vmem:[#allocation11 + $0x6d4] sm:$0xf0]  ;;  %v2702_v38 = vor.u32 %v3599_v28, %v2699_v31  ;;  %v2491_v28 = vld [vmem:[#allocation11 + $0x58] sm:$0xf0]  ;;  %v3611_v31 = vld [vmem:[#allocation11 + $0x24c] sm:$0xf]  ;;  %v3258_v33 = vor.u32 %v3741_v21, %v3257_v20 }
  0xb9   :  { %v3723_v12 = vld [vmem:[#allocation11 + $0x5cc] sm:$0xf]  ;;  %v3195_v13 = vld [vmem:[#allocation11 + $0x5d8] sm:$0xf0] }
  0xba   :  { %v2923_v20 = vld [vmem:[#allocation11 + $0x3b8] sm:$0xf0]  ;;  %v3198_v21 = vor.u32 %v3723_v12, %v3195_v13  ;;  %v3739_v13 = vld [vmem:[#allocation11 + $0x64c] sm:$0xf] }
  0xbb   :  { %1777 = vmatpush.bf16.msra.mxu0 %v2762_v49  ;;  %1790 = vmatpush.bf16.msra.mxu1 %v2890_v50  ;;  %v2811_v49 = vld [vmem:[#allocation11 + $0x2d8] sm:$0xf0]  ;;  %v3322_v50 = vor.u32 %v3757_v37, %v3321_v36  ;;  %v2750_v36 = vor.u32 %v3611_v31, %v2747_v32  ;;  %v3543_v37 = vld [vmem:[#allocation11 + $0x2c] sm:$0xf] }
  0xbc   :  { %1803 = vmatpush.bf16.msra.mxu2 %v3018_v53  ;;  %1816 = vmatpush.bf16.msra.mxu3 %v3146_v54  ;;  %v3753_v53 = vld [vmem:[#allocation11 + $0x6b4] sm:$0xf0]  ;;  %v2686_v54 = vor.u32 %v3595_v42, %v2683_v46  ;;  %v2814_v55 = vor.u32 %v3627_v47, %v2811_v49  ;;  %v2731_v42 = vld [vmem:[#allocation11 + $0x238] sm:$0xf0]  ;;  %v3225_v46 = vld [vmem:[#allocation11 + $0x608] sm:$0xf] }
  0xbd   :  { %v3751_v31 = vld [vmem:[#allocation11 + $0x6ac] sm:$0xf]  ;;  %v3307_v32 = vld [vmem:[#allocation11 + $0x6b8] sm:$0xf0] }
  0xbe   :  { %v3131_v12 = vld [vmem:[#allocation11 + $0x558] sm:$0xf0] }
  0xbf   :  { %1778 = vmatpush.bf16.msra.mxu0 %v2746_v61  ;;  %1791 = vmatpush.bf16.msra.mxu1 %v2874_v62  ;;  %v2795_v61 = vld [vmem:[#allocation11 + $0x2b8] sm:$0xf0]  ;;  %v3306_v62 = vor.u32 %v3753_v53, %v3305_v52 }
  0xc0   :  { %1804 = vmatpush.bf16.msra.mxu2 %v3002_v1  ;;  %1817 = vmatpush.bf16.msra.mxu3 %v3130_v2  ;;  %v3749_v1 = vld [vmem:[#allocation11 + $0x694] sm:$0xf0]  ;;  %v2670_v2 = vor.u32 %v3591_v58, %v2667_v59  ;;  %v2798_v3 = vor.u32 %v3623_v60, %v2795_v61  ;;  %v2459_v52 = vld [vmem:[#allocation11 + $0x18] sm:$0xf0]  ;;  %v3663_v59 = vld [vmem:[#allocation11 + $0x3ec] sm:$0xf] }
  0xc1   :  { %v2715_v58 = vld [vmem:[#allocation11 + $0x218] sm:$0xf0]  ;;  %v3695_v61 = vld [vmem:[#allocation11 + $0x4ec] sm:$0xf] }
  0xc2   :  { %v2955_v60 = vld [vmem:[#allocation11 + $0x3f8] sm:$0xf0] }
  0xc3   :  { %1779 = vmatpush.bf16.msra.mxu0 %v2730_v10  ;;  %1792 = vmatpush.bf16.msra.mxu1 %v2858_v11  ;;  %v2654_v10 = vor.u32 %v3587_v5, %v2651_v6  ;;  %v2718_v5 = vor.u32 %v3603_v57, %v2715_v58  ;;  %v4228_v6 = vld [vmem:[#allocation12] sm:$0xf] }
  0xc4   :  { %1805 = vmatpush.bf16.msra.mxu2 %v2986_v15  ;;  %1818 = vmatpush.bf16.msra.mxu3 %v3114_v16  ;;  %v2635_v15 = vld [vmem:[#allocation11 + $0x178] sm:$0xf0]  ;;  %v3615_v16 = vld [vmem:[#allocation11 + $0x26c] sm:$0xf] }
  0xc5   :  { %v2638_v22 = vor.u32 %v3583_v14, %v2635_v15  ;;  %v2766_v26 = vor.u32 %v3615_v16, %v2763_v17  ;;  %v3755_v14 = vld [vmem:[#allocation11 + $0x6cc] sm:$0xf]  ;;  %v3323_v15 = vld [vmem:[#allocation11 + $0x6d8] sm:$0xf0]  ;;  %v421_v16 = vperm.slane %v4228_v6, 0 }
  0xc7   :  { %1780 = vmatpush.bf16.msra.mxu0 %v2714_v29  ;;  %1793 = vmatpush.bf16.msra.mxu1 %v2842_v30  ;;  %v3579_v29 = vld [vmem:[#allocation11 + $0x14c] sm:$0xf]  ;;  %v2619_v30 = vld [vmem:[#allocation11 + $0x158] sm:$0xf0] }
  0xc8   :  { %1806 = vmatpush.bf16.msra.mxu2 %v2970_v34  ;;  %1819 = vmatpush.bf16.msra.mxu3 %v3098_v44  ;;  %v2494_v34 = vor.u32 %v3547_v27, %v2491_v28  ;;  %v3241_v44 = vld [vmem:[#allocation11 + $0x628] sm:$0xf]  ;;  %v3051_v27 = vld [vmem:[#allocation11 + $0x4b8] sm:$0xf0]  ;;  %v3719_v28 = vld [vmem:[#allocation11 + $0x5ac] sm:$0xf] }
  0xca   :  { %1781 = vmatmul.bf16.vlgmr.msra.gmra.mxu0 %v4194_v43  ;;  %1794 = vmatmul.bf16.vlgmr.msra.gmra.mxu1 %v4202_v48  ;;  %v2779_v43 = vld [vmem:[#allocation11 + $0x298] sm:$0xf0] }
  0xcb   :  { %1825 = vmatpush.bf16.msrb.mxu0 %v3338_v45  ;;  %1838 = vmatpush.bf16.msrb.mxu1 %v2574_v35  ;;  %v2782_v11 = vor.u32 %v3619_v7, %v2779_v43  ;;  %v3737_v45 = vld [vmem:[#allocation11 + $0x634] sm:$0xf0]  ;;  %v2622_v35 = vor.u32 %v3579_v29, %v2619_v30  ;;  %v2958_v7 = vor.u32 %v3663_v59, %v2955_v60  ;;  %v3840_v29 = vld [vmem:[#allocation1 + $0x9] sm:$0xff]  ;;  %v3179_v30 = vld [vmem:[#allocation11 + $0x5b8] sm:$0xf0] }
  0xcc   :  { %1851 = vmatpush.bf16.msrb.mxu2 %v2702_v38  ;;  %1864 = vmatpush.bf16.msrb.mxu3 %v2830_v39  ;;  %v2475_v38 = vld [vmem:[#allocation11 + $0x38] sm:$0xf0]  ;;  %v3575_v39 = vld [vmem:[#allocation11 + $0x12c] sm:$0xf]  ;;  %v3242_v47 = vor.u32 %v3737_v45, %v3241_v44 }
  0xcd   :  { %1807 = vmatmul.bf16.vlgmr.msra.gmra.mxu2 %v4208_v24  ;;  %1820 = vmatmul.bf16.vlgmr.msra.gmra.mxu3 %v4210_v25  ;;  %v3555_v24 = vld [vmem:[#allocation11 + $0x8c] sm:$0xf]  ;;  %v3290_v25 = vor.u32 %v3749_v1, %v3289_v0  ;;  %v2478_v49 = vor.u32 %v3543_v37, %v2475_v38  ;;  %v2606_v53 = vor.u32 %v3575_v39, %v2603_v40  ;;  %v3842_v44 = vld [vmem:[#allocation1] sm:$0xff] }
  0xce   :  { %v2526_v48 = vor.u32 %v3555_v24, %v2523_v4  ;;  %v3339_v24 = vld [vmem:[#allocation11 + $0x6f8] sm:$0xf0]  ;;  %v3651_v38 = vld [vmem:[#allocation11 + $0x38c] sm:$0xf]  ;;  %v3310_v40 = vor.u32 %v3751_v31, %v3307_v32 }
  0xcf   :  { %1826 = vmatpush.bf16.msrb.mxu0 %v3322_v50  ;;  %1839 = vmatpush.bf16.msrb.mxu1 %v2558_v51  ;;  %v3733_v50 = vld [vmem:[#allocation11 + $0x614] sm:$0xf0]  ;;  %v3539_v51 = vld [vmem:[#allocation11 + $0xc] sm:$0xf]  ;;  %v2907_v39 = vld [vmem:[#allocation11 + $0x398] sm:$0xf0] }
  0xd0   :  { %1852 = vmatpush.bf16.msrb.mxu2 %v2686_v54  ;;  %1865 = vmatpush.bf16.msrb.mxu3 %v2814_v55  ;;  %v2734_v54 = vor.u32 %v3607_v41, %v2731_v42  ;;  %v3571_v55 = vld [vmem:[#allocation11 + $0x10c] sm:$0xf]  ;;  %v3226_v0 = vor.u32 %v3733_v50, %v3225_v46  ;;  %v2462_v1 = vor.u32 %v3539_v51, %v2459_v52  ;;  %v3035_v42 = vld [vmem:[#allocation11 + $0x498] sm:$0xf0] }
  0xd1   :  { %v2590_v4 = vor.u32 %v3571_v55, %v2587_v56  ;;  %v3683_v41 = vld [vmem:[#allocation11 + $0x48c] sm:$0xf]  ;;  %v3291_v51 = vld [vmem:[#allocation11 + $0x698] sm:$0xf0]  ;;  %v2910_v52 = vor.u32 %v3651_v38, %v2907_v39 }
  0xd2   :  { %v3715_v46 = vld [vmem:[#allocation11 + $0x58c] sm:$0xf]  ;;  %v2891_v55 = vld [vmem:[#allocation11 + $0x378] sm:$0xf0] }
  0xd3   :  { %1827 = vmatpush.bf16.msrb.mxu0 %v3306_v62  ;;  %1840 = vmatpush.bf16.msrb.mxu1 %v2542_v63  ;;  %v3083_v62 = vld [vmem:[#allocation11 + $0x4f8] sm:$0xf0]  ;;  %v3727_v63 = vld [vmem:[#allocation11 + $0x5ec] sm:$0xf] }
  0xd4   :  { %1853 = vmatpush.bf16.msrb.mxu2 %v2670_v2  ;;  %1866 = vmatpush.bf16.msrb.mxu3 %v2798_v3  ;;  %v3211_v2 = vld [vmem:[#allocation11 + $0x5f8] sm:$0xf0]  ;;  %v3759_v3 = vld [vmem:[#allocation11 + $0x6ec] sm:$0xf]  ;;  %v3086_v43 = vor.u32 %v3695_v61, %v3083_v62 }
  0xd5   :  { %v3214_v8 = vor.u32 %v3727_v63, %v3211_v2  ;;  %v3342_v9 = vor.u32 %v3759_v3, %v3339_v24  ;;  %v3747_v50 = vld [vmem:[#allocation11 + $0x68c] sm:$0xf]  ;;  %v3019_v60 = vld [vmem:[#allocation11 + $0x478] sm:$0xf0] }
  0xd6   :  { %v3294_v58 = vor.u32 %v3747_v50, %v3291_v51  ;;  %v3679_v59 = vld [vmem:[#allocation11 + $0x46c] sm:$0xf]  ;;  %v3275_v2 = vld [vmem:[#allocation11 + $0x678] sm:$0xf0] }
  0xd7   :  { %1828 = vmatpush.bf16.msrb.mxu0 %v3290_v25  ;;  %1841 = vmatpush.bf16.msrb.mxu1 %v2526_v48  ;;  %v3659_v25 = vld [vmem:[#allocation11 + $0x3cc] sm:$0xf]  ;;  %v2939_v48 = vld [vmem:[#allocation11 + $0x3d8] sm:$0xf0] }
  0xd8   :  { %1854 = vmatpush.bf16.msrb.mxu2 %v2654_v10  ;;  %1867 = vmatpush.bf16.msrb.mxu3 %v2782_v11  ;;  %v3691_v10 = vld [vmem:[#allocation11 + $0x4cc] sm:$0xf]  ;;  %v3067_v11 = vld [vmem:[#allocation11 + $0x4d8] sm:$0xf0]  ;;  %v2942_v17 = vor.u32 %v3659_v25, %v2939_v48 }
  0xd9   :  { %v3711_v61 = vld [vmem:[#allocation11 + $0x56c] sm:$0xf]  ;;  %v2875_v25 = vld [vmem:[#allocation11 + $0x358] sm:$0xf0] }
  0xda   :  { %v3243_v31 = vld [vmem:[#allocation11 + $0x638] sm:$0xf0]  ;;  %v3667_v39 = vld [vmem:[#allocation11 + $0x40c] sm:$0xf] }
  0xdb   :  { %1829 = vmatpush.bf16.msrb.mxu0 %v3274_v18  ;;  %1842 = vmatpush.bf16.msrb.mxu1 %v2510_v19  ;;  %v3070_v18 = vor.u32 %v3691_v10, %v3067_v11  ;;  %v3655_v19 = vld [vmem:[#allocation11 + $0x3ac] sm:$0xf]  ;;  %v3003_v10 = vld [vmem:[#allocation11 + $0x458] sm:$0xf0] }
  0xdc   :  { %1855 = vmatpush.bf16.msrb.mxu2 %v2638_v22  ;;  %1868 = vmatpush.bf16.msrb.mxu3 %v2766_v26  ;;  %v3326_v22 = vor.u32 %v3755_v14, %v3323_v15  ;;  %v3687_v26 = vld [vmem:[#allocation11 + $0x4ac] sm:$0xf]  ;;  %v3259_v14 = vld [vmem:[#allocation11 + $0x658] sm:$0xf0] }
  0xdd   :  { %v3054_v37 = vor.u32 %v3687_v26, %v3051_v27  ;;  %v3707_v11 = vld [vmem:[#allocation11 + $0x54c] sm:$0xf]  ;;  %v2987_v26 = vld [vmem:[#allocation11 + $0x438] sm:$0xf0] }
  0xde   :  { %v3703_v27 = vld [vmem:[#allocation11 + $0x52c] sm:$0xf] }
  0xdf   :  { %1830 = vmatpush.bf16.msrb.mxu0 %v3258_v33  ;;  %1843 = vmatpush.bf16.msrb.mxu1 %v2494_v34  ;;  %v3841_v34 = vld [vmem:[#allocation1 + $0x12] sm:$0xff] }
  0xe0   :  { %1856 = vmatpush.bf16.msrb.mxu2 %v2622_v35  ;;  %1869 = vmatpush.bf16.msrb.mxu3 %v2750_v36  ;;  %v2926_v36 = vor.u32 %v3655_v19, %v2923_v20  ;;  %v3134_v20 = vor.u32 %v3707_v11, %v3131_v12 }
  0xe3   :  { %1831 = vmatpush.bf16.msrb.mxu0 %v3242_v47  ;;  %1844 = vmatpush.bf16.msrb.mxu1 %v2478_v49  ;;  %v3163_v49 = vld [vmem:[#allocation11 + $0x598] sm:$0xf0] }
  0xe4   :  { %1857 = vmatpush.bf16.msrb.mxu2 %v2606_v53  ;;  %1870 = vmatpush.bf16.msrb.mxu3 %v2734_v54  ;;  %v3038_v53 = vor.u32 %v3683_v41, %v3035_v42  ;;  %v3647_v54 = vld [vmem:[#allocation11 + $0x36c] sm:$0xf]  ;;  %v3166_v57 = vor.u32 %v3715_v46, %v3163_v49  ;;  %v3099_v42 = vld [vmem:[#allocation11 + $0x518] sm:$0xf0] }
  0xe5   :  { %v3731_v46 = vld [vmem:[#allocation11 + $0x60c] sm:$0xf] }
  0xe6   :  { %v1574_v33 = vpop.f32.mrf.mxu0 }
  0xe7   :  { %1832 = vmatpush.bf16.msrb.mxu0 %v3226_v0  ;;  %1845 = vmatpush.bf16.msrb.mxu1 %v2462_v1  ;;  %v1575_v45 = vadd.f32 %v1574_v33, %v421_v16  ;;  %v1587_v35 = vpop.f32.mrf.mxu1  ;;  %v3147_v0 = vld [vmem:[#allocation11 + $0x578] sm:$0xf0]  ;;  %v3743_v1 = vld [vmem:[#allocation11 + $0x66c] sm:$0xf] }
  0xe8   :  { %1858 = vmatpush.bf16.msrb.mxu2 %v2590_v4  ;;  %1871 = vmatpush.bf16.msrb.mxu3 %v2718_v5  ;;  %v2894_v5 = vor.u32 %v3647_v54, %v2891_v55  ;;  %v3150_v48 = vor.u32 %v3711_v61, %v3147_v0  ;;  %v3846_v61 = vld [vmem:[#allocation1 + $0x36] sm:$0xff] }
  0xe9   :  { %v1588_v47 = vadd.f32 %v1587_v35, %v1575_v45  ;;  %v3635_v35 = vld [vmem:[#allocation11 + $0x30c] sm:$0xf] }
  0xea   :  { %1833 = vmatmul.bf16.vlgmr.msrb.gmra.mxu0 %v4206_v23  ;;  %1846 = vmatmul.bf16.vlgmr.msrb.gmra.mxu1 %v3842_v44  ;;  %v3182_v23 = vor.u32 %v3719_v28, %v3179_v30  ;;  %v3735_v30 = vld [vmem:[#allocation11 + $0x62c] sm:$0xf] }
  0xeb   :  { %1877 = vmatpush.bf16.msra.mxu0 %v2958_v7  ;;  %1890 = vmatpush.bf16.msra.mxu1 %v3086_v43  ;;  %v3022_v7 = vor.u32 %v3679_v59, %v3019_v60  ;;  %v3643_v43 = vld [vmem:[#allocation11 + $0x34c] sm:$0xf]  ;;  %v3246_v38 = vor.u32 %v3735_v30, %v3243_v31  ;;  %v3844_v59 = vld [vmem:[#allocation1 + $0x24] sm:$0xff] }
  0xec   :  { %1903 = vmatpush.bf16.msra.mxu2 %v3214_v8  ;;  %1916 = vmatpush.bf16.msra.mxu3 %v3342_v9  ;;  %v1600_v56 = vpop.f32.mrf.mxu2  ;;  %v3278_v8 = vor.u32 %v3743_v1, %v3275_v2  ;;  %v3675_v9 = vld [vmem:[#allocation11 + $0x44c] sm:$0xf]  ;;  %v2878_v15 = vor.u32 %v3643_v43, %v2875_v25  ;;  %v422_v43 = vperm.slane %v4228_v6, 1 }
  0xed   :  { %1859 = vmatmul.bf16.vlgmr.msrb.gmra.mxu2 %v3840_v29  ;;  %1872 = vmatmul.bf16.vlgmr.msrb.gmra.mxu3 %v3841_v34  ;;  %v1601_v62 = vadd.f32 %v1600_v56, %v1588_v47  ;;  %v1613_v63 = vpop.f32.mrf.mxu3  ;;  %v3006_v16 = vor.u32 %v3675_v9, %v3003_v10  ;;  %v3115_v29 = vld [vmem:[#allocation11 + $0x538] sm:$0xf0]  ;;  %v3845_v60 = vld [vmem:[#allocation1 + $0x2d] sm:$0xff] }
  0xee   :  { %v1576_v3 = vpop.f32.mrf.mxu0  ;;  %v3227_v47 = vld [vmem:[#allocation11 + $0x618] sm:$0xf0] }
  0xef   :  { %1878 = vmatpush.bf16.msra.mxu0 %v2942_v17  ;;  %1891 = vmatpush.bf16.msra.mxu1 %v3070_v18  ;;  %v1589_v24 = vpop.f32.mrf.mxu1  ;;  %v1614_v4 = vadd.f32 %v1613_v63, %v1601_v62  ;;  %v3639_v17 = vld [vmem:[#allocation11 + $0x32c] sm:$0xf]  ;;  %v2859_v18 = vld [vmem:[#allocation11 + $0x338] sm:$0xf0] }
  0xf0   :  { %1904 = vmatpush.bf16.msra.mxu2 %v3198_v21  ;;  %1917 = vmatpush.bf16.msra.mxu3 %v3326_v22  ;;  %v3262_v21 = vor.u32 %v3739_v13, %v3259_v14  ;;  %v3671_v22 = vld [vmem:[#allocation11 + $0x42c] sm:$0xf]  ;;  %v2862_v44 = vor.u32 %v3639_v17, %v2859_v18  ;;  %v139_v10 = vld [vmem:[#allocation9] sm:$0x3] }
  0xf1   :  { %v2990_v45 = vor.u32 %v3671_v22, %v2987_v26  ;;  %140 = vst [vmem:[#allocation18] sm:$0x3] %v139_v10 }
  0xf3   :  { %1879 = vmatpush.bf16.msra.mxu0 %v2926_v36  ;;  %1892 = vmatpush.bf16.msra.mxu1 %v3054_v37  ;;  %v2843_v36 = vld [vmem:[#allocation11 + $0x318] sm:$0xf0]  ;;  %v3118_v37 = vor.u32 %v3703_v27, %v3115_v29 }
  0xf4   :  { %1905 = vmatpush.bf16.msra.mxu2 %v3182_v23  ;;  %1918 = vmatpush.bf16.msra.mxu3 %v3310_v40  ;;  %v1602_v19 = vpop.f32.mrf.mxu2  ;;  %v2971_v23 = vld [vmem:[#allocation11 + $0x418] sm:$0xf0]  ;;  %v3699_v40 = vld [vmem:[#allocation11 + $0x50c] sm:$0xf]  ;;  %v2846_v49 = vor.u32 %v3635_v35, %v2843_v36 }
  0xf5   :  { %v1615_v28 = vpop.f32.mrf.mxu3  ;;  %v2974_v50 = vor.u32 %v3667_v39, %v2971_v23  ;;  %v3807_v39 = vld [vmem:[#allocation14 + $0x164] sm:$0xf0]  ;;  %v3804_v23 = vld [vmem:[#allocation14 + $0x154] sm:$0xf] }
  0xf6   :  { %v1626_v32 = vpop.f32.mrf.mxu0 }
  0xf7   :  { %1880 = vmatpush.bf16.msra.mxu0 %v2910_v52  ;;  %1893 = vmatpush.bf16.msra.mxu1 %v3038_v53  ;;  %v1627_v33 = vadd.f32 %v1626_v32, %v1614_v4  ;;  %v1639_v34 = vpop.f32.mrf.mxu1  ;;  %v3102_v52 = vor.u32 %v3699_v40, %v3099_v42  ;;  %v3230_v53 = vor.u32 %v3731_v46, %v3227_v47  ;;  %v423_v32 = vperm.slane %v4228_v6, 2  ;;  %v3518_v42 = vld [vmem:[#allocation14 + $0x168] sm:$0xf0] }
  0xf8   :  { %1906 = vmatpush.bf16.msra.mxu2 %v3166_v57  ;;  %1919 = vmatpush.bf16.msra.mxu3 %v3294_v58  ;;  %v3843_v58 = vld [vmem:[#allocation1 + $0x1b] sm:$0xff] }
  0xf9   :  { %v1640_v41 = vadd.f32 %v1639_v34, %v1627_v33 }
  0xfb   :  { %1881 = vmatpush.bf16.msra.mxu0 %v2894_v5  ;;  %1894 = vmatpush.bf16.msra.mxu1 %v3022_v7 }
  0xfc   :  { %1907 = vmatpush.bf16.msra.mxu2 %v3150_v48  ;;  %1920 = vmatpush.bf16.msra.mxu3 %v3278_v8  ;;  %v1652_v51 = vpop.f32.mrf.mxu2 }
  0xfd   :  { %v1653_v54 = vadd.f32 %v1652_v51, %v1640_v41  ;;  %v1665_v55 = vpop.f32.mrf.mxu3 }
  0xfe   :  { %v1628_v56 = vpop.f32.mrf.mxu0  ;;  %v1666_v25 = vadd.f32 %v1665_v55, %v422_v43 }
  0xff   :  { %1882 = vmatpush.bf16.msra.mxu0 %v2878_v15  ;;  %1895 = vmatpush.bf16.msra.mxu1 %v3006_v16  ;;  %v1641_v57 = vpop.f32.mrf.mxu1  ;;  %v3343_v26 = vmul.f32 -1.442695, %v1653_v54 }
 0x100   :  { %1908 = vmatpush.bf16.msra.mxu2 %v3134_v20  ;;  %1921 = vmatpush.bf16.msra.mxu3 %v3262_v21 }
 0x103   :  { %1883 = vmatpush.bf16.msra.mxu0 %v2862_v44  ;;  %1896 = vmatpush.bf16.msra.mxu1 %v2990_v45 }
 0x104   :  { %1909 = vmatpush.bf16.msra.mxu2 %v3118_v37  ;;  %1922 = vmatpush.bf16.msra.mxu3 %v3246_v38  ;;  %v1654_v62 = vpop.f32.mrf.mxu2  ;;  %v3516_v38 = vld [vmem:[#allocation14 + $0x150] sm:$0xf] }
 0x105   :  { %v1667_v63 = vpop.f32.mrf.mxu3  ;;  %v3517_v41 = vor.u32 %v3807_v39, %v3516_v38 }
 0x106   :  { %v3492_v63 = vld [vmem:[#allocation14 + $0x120] sm:$0xf] }
 0x107   :  { %1884 = vmatpush.bf16.msra.mxu0 %v2846_v49  ;;  %1897 = vmatpush.bf16.msra.mxu1 %v2974_v50  ;;  %v1678_v0 = vpop.f32.mrf.mxu0  ;;  %v1691_v1 = vpop.f32.mrf.mxu1  ;;  %v3521_v49 = vor.u32 %v3804_v23, %v3518_v42  ;;  %v3808_v23 = vld [vmem:[#allocation14 + $0x16c] sm:$0xf0]  ;;  %v424_v42 = vperm.slane %v4228_v6, 3 }
 0x108   :  { %1910 = vmatpush.bf16.msra.mxu2 %v3102_v52  ;;  %1923 = vmatpush.bf16.msra.mxu3 %v3230_v53  ;;  %v1679_v48 = vadd.f32 %v1678_v0, %v1666_v25  ;;  %v3801_v0 = vld [vmem:[#allocation14 + $0x134] sm:$0xf0] }
 0x10a   :  { %1885 = vmatmul.bf16.vlgmr.msra.gmra.mxu0 %v3843_v58  ;;  %1898 = vmatmul.bf16.vlgmr.msra.gmra.mxu1 %v3844_v59  ;;  %v1692_v11 = vadd.f32 %v1691_v1, %v1679_v48  ;;  %v3798_v1 = vld [vmem:[#allocation14 + $0x124] sm:$0xf] }
 0x10b   :  { %1911 = vmatmul.bf16.vlgmr.msra.gmra.mxu2 %v3845_v60  ;;  %1924 = vmatmul.bf16.vlgmr.msra.gmra.mxu3 %v3846_v61 }
 0x10c   :  { %2298 = vmatpush.bf16.msrb.mxu0 %v3517_v41  ;;  %2311 = vmatpush.bf16.msrb.mxu1 %v3521_v49  ;;  %v3526_v41 = vld [vmem:[#allocation14 + $0x170] sm:$0xf0]  ;;  %v3420_v49 = vld [vmem:[#allocation14 + $0x90] sm:$0xf] }
 0x10f   :  { %v1680_v24 = vpop.f32.mrf.mxu0  ;;  %v1693_v4 = vpop.f32.mrf.mxu1 }
 0x110   :  { %v1704_v2 = vpop.f32.mrf.mxu2  ;;  %v1717_v3 = vpop.f32.mrf.mxu3  ;;  %v3493_v4 = vor.u32 %v3801_v0, %v3492_v63  ;;  %v3774_v63 = vld [vmem:[#allocation14 + $0x64] sm:$0xf] }
 0x111   :  { %v1705_v14 = vadd.f32 %v1704_v2, %v1692_v11 }
 0x112   :  { %2299 = vmatpush.bf16.msrb.mxu0 %v3493_v4 }
 0x113   :  { %v1718_v17 = vadd.f32 %v1717_v3, %v1705_v14 }
 0x118   :  { %v1706_v5 = vpop.f32.mrf.mxu2  ;;  %v1719_v7 = vpop.f32.mrf.mxu3 }
 0x119   :  { %v3494_v5 = vld [vmem:[#allocation14 + $0x138] sm:$0xf0] }
 0x11a   :  { %v3497_v25 = vor.u32 %v3798_v1, %v3494_v5  ;;  %v3398_v1 = vld [vmem:[#allocation14 + $0x78] sm:$0xf0] }
 0x11b   :  { %v3401_v4 = vor.u32 %v3774_v63, %v3398_v1  ;;  %v3769_v1 = vld [vmem:[#allocation14 + $0x3c] sm:$0xf] }
 0x11c   :  { %2312 = vmatpush.bf16.msrb.mxu1 %v3497_v25 }
 0x127   :  { %v1730_v8 = vpop.f32.mrf.mxu0  ;;  %v1743_v9 = vpop.f32.mrf.mxu1 }
 0x128   :  { %v1731_v18 = vadd.f32 %v1730_v8, %v1718_v17 }
 0x12a   :  { %v1744_v21 = vadd.f32 %v1743_v9, %v1731_v18 }
 0x12c   :  { %v3344_v22 = vmul.f32 -1.442695, %v1744_v21  ;;  %v3468_v21 = vld [vmem:[#allocation14 + $0xf0] sm:$0xf] }
 0x12e   :  { %3824 = vpow2.f32 %v3344_v22  ;;  %v3795_v22 = vld [vmem:[#allocation14 + $0x104] sm:$0xf0] }
 0x12f   :  { %v1732_v15 = vpop.f32.mrf.mxu0  ;;  %v1745_v16 = vpop.f32.mrf.mxu1  ;;  %3826 = vpow2.f32 %v3343_v26  ;;  %v3792_v26 = vld [vmem:[#allocation14 + $0xf4] sm:$0xf] }
 0x130   :  { %v1756_v12 = vpop.f32.mrf.mxu2  ;;  %v1769_v13 = vpop.f32.mrf.mxu3  ;;  %v1987_v15 = vld [vmem:[#allocation18] sm:$0x3] }
 0x131   :  { %v1757_v35 = vadd.f32 %v1756_v12, %v423_v32 }
 0x133   :  { %v1770_v37 = vadd.f32 %v1769_v13, %v1757_v35 }
 0x134   :  { %v3825_v29 = vpop.eup %3824 }
 0x135   :  { %v3827_v30 = vpop.eup %3826  ;;  %v1951_v31 = vadd.f32 1.0, %v3825_v29  ;;  %v3469_v29 = vor.u32 %v3795_v22, %v3468_v21 }
 0x136   :  { %v4234_v34 = vadd.f32 1.0, %v3827_v30  ;;  %v3470_v30 = vld [vmem:[#allocation14 + $0x108] sm:$0xf0] }
 0x137   :  { %3828 = vrcp.f32 %v1951_v31  ;;  %v1963_v2 = vand.u32 2147483648, %v1951_v31  ;;  %vm1957_vm8 = vweird.f32 %v1951_v31  ;;  %v1961_v43 = vand.u32 2147483647, %v1951_v31  ;;  %2300 = vmatpush.bf16.msrb.mxu0 %v3469_v29 }
 0x138   :  { %v1758_v19 = vpop.f32.mrf.mxu2  ;;  %v1771_v20 = vpop.f32.mrf.mxu3  ;;  %3830 = vrcp.f32 %v4234_v34  ;;  %vm1938_vm6 = vweird.f32 %v4234_v34  ;;  %v1944_v48 = vand.u32 2147483648, %v4234_v34  ;;  %v1942_v8 = vand.u32 2147483647, %v4234_v34 }
 0x139   :  { %v1964_v10 = vor.u32 1.1754944e-38, %v1963_v2  ;;  %vm1962_vm11 = vcmp.eq.f32.partialorder %v1961_v43, 8.507059e+37  ;;  %v3476_v2 = vld [vmem:[#allocation14 + $0xf8] sm:$0xf]  ;;  %v3478_v43 = vld [vmem:[#allocation14 + $0x110] sm:$0xf0] }
 0x13a   :  { %v1945_v13 = vor.u32 1.1754944e-38, %v1944_v48  ;;  %vm1943_vm12 = vcmp.eq.f32.partialorder %v1942_v8, 8.507059e+37  ;;  %v3771_v8 = vld [vmem:[#allocation14 + $0x44] sm:$0xf0] }
 0x13d   :  { %v3829_v46 = vpop.eup %3828 }
 0x13e   :  { %v3831_v50 = vpop.eup %3830  ;;  %v1953_v52 = vmul.f32 %v3829_v46, %v1951_v31  ;;  %vm1958_vm5 = vweird.f32 %v3829_v46  ;;  %v3473_v31 = vor.u32 %v3792_v26, %v3470_v30  ;;  %v3348_v26 = vld [vmem:[#allocation14] sm:$0xf]  ;;  %v3350_v30 = vld [vmem:[#allocation14 + $0x18] sm:$0xf0] }
 0x13f   :  { %v1934_v53 = vmul.f32 %v3831_v50, %v4234_v34  ;;  %vm1939_vm7 = vweird.f32 %v3831_v50  ;;  %vm1959_vm9 = vmor %vm1957_vm8, %vm1958_vm5  ;;  %v3789_v34 = vld [vmem:[#allocation14 + $0xd4] sm:$0xf0] }
 0x140   :  { %v1954_v55 = vsub.f32 1.0, %v1953_v52  ;;  %vm1940_vm10 = vmor %vm1938_vm6, %vm1939_vm7  ;;  %2313 = vmatpush.bf16.msrb.mxu1 %v3473_v31  ;;  %v3428_v31 = vld [vmem:[#allocation14 + $0x98] sm:$0xf] }
 0x141   :  { %v1935_v56 = vsub.f32 1.0, %v1934_v53  ;;  %v3422_v53 = vld [vmem:[#allocation14 + $0xa8] sm:$0xf0] }
 0x142   :  { %v1955_v58 = vmul.f32 %v3829_v46, %v1954_v55  ;;  %v3802_v55 = vld [vmem:[#allocation14 + $0x13c] sm:$0xf0] }
 0x143   :  { %v1936_v59 = vmul.f32 %v3831_v50, %v1935_v56 }
 0x144   :  { %v1956_v62 = vadd.f32 %v3829_v46, %v1955_v58  ;;  %v3799_v58 = vld [vmem:[#allocation14 + $0x12c] sm:$0xf] }
 0x145   :  { %v1937_v7 = vadd.f32 %v3831_v50, %v1936_v59  ;;  %v3502_v59 = vld [vmem:[#allocation14 + $0x140] sm:$0xf0] }
 0x146   :  { %v1960_v9 = vsel %vm1959_vm9, %v3829_v46, %v1956_v62  ;;  %v3777_v62 = vld [vmem:[#allocation14 + $0x74] sm:$0xf0] }
 0x147   :  { %v1782_v27 = vpop.f32.mrf.mxu0  ;;  %v1795_v28 = vpop.f32.mrf.mxu1  ;;  %v1941_v11 = vsel %vm1940_vm10, %v3831_v50, %v1937_v7  ;;  %v1965_v14 = vsel %vm1962_vm11, %v1964_v10, %v1960_v9  ;;  %v3783_v50 = vld [vmem:[#allocation14 + $0xa4] sm:$0xf0]  ;;  %v3793_v7 = vld [vmem:[#allocation14 + $0xfc] sm:$0xf]  ;;  %v3768_v9 = vld [vmem:[#allocation14 + $0x34] sm:$0xf] }
 0x148   :  { %v1783_v51 = vadd.f32 %v1782_v27, %v1770_v37  ;;  %v1946_v19 = vsel %vm1943_vm12, %v1945_v13, %v1941_v11  ;;  %v1988_v27 = vmul.f32 %v1987_v15, %v1965_v14  ;;  %v3524_v37 = vld [vmem:[#allocation14 + $0x158] sm:$0xf]  ;;  %v3421_v52 = vor.u32 %v3783_v50, %v3420_v49  ;;  %v3374_v11 = vld [vmem:[#allocation14 + $0x48] sm:$0xf0]  ;;  %v3452_v13 = vld [vmem:[#allocation14 + $0xc8] sm:$0xf] }
 0x149   :  { %v3525_v46 = vor.u32 %v3808_v23, %v3524_v37  ;;  %v3481_v25 = vor.u32 %v3793_v7, %v3478_v43  ;;  %v3790_v14 = vld [vmem:[#allocation14 + $0xdc] sm:$0xf0]  ;;  %v3377_v15 = vor.u32 %v3768_v9, %v3374_v11  ;;  %v3534_v23 = vld [vmem:[#allocation14 + $0x178] sm:$0xf0]  ;;  %v3797_v7 = vld [vmem:[#allocation14 + $0x114] sm:$0xf0] }
 0x14a   :  { %v1796_v54 = vadd.f32 %v1795_v28, %v1783_v51  ;;  %v3780_v51 = vld [vmem:[#allocation14 + $0x94] sm:$0xf]  ;;  %v3532_v37 = vld [vmem:[#allocation14 + $0x160] sm:$0xf]  ;;  %v3794_v43 = vld [vmem:[#allocation14 + $0x104] sm:$0xf] }
 0x14b   :  { %2324 = vmatpush.bf16.msrb.mxu2 %v3525_v46  ;;  %v3425_v56 = vor.u32 %v3780_v51, %v3422_v53  ;;  %v3778_v46 = vld [vmem:[#allocation14 + $0x7c] sm:$0xf0]  ;;  %v3406_v51 = vld [vmem:[#allocation14 + $0x80] sm:$0xf0]  ;;  %v3803_v53 = vld [vmem:[#allocation14 + $0x144] sm:$0xf0] }
 0x14c   :  { %v3766_v9 = vld [vmem:[#allocation14 + $0x1c] sm:$0xf0]  ;;  %v3763_v11 = vld [vmem:[#allocation14 + $0xc] sm:$0xf] }
 0x14f   :  { %v1784_v45 = vpop.f32.mrf.mxu0  ;;  %v1797_v36 = vpop.f32.mrf.mxu1 }
 0x150   :  { %v1808_v33 = vpop.f32.mrf.mxu2  ;;  %v1821_v44 = vpop.f32.mrf.mxu3  ;;  %v3446_v36 = vld [vmem:[#allocation14 + $0xd8] sm:$0xf0] }
 0x151   :  { %v1809_v57 = vadd.f32 %v1808_v33, %v1796_v54  ;;  %v3444_v33 = vld [vmem:[#allocation14 + $0xc0] sm:$0xf]  ;;  %v3500_v54 = vld [vmem:[#allocation14 + $0x128] sm:$0xf] }
 0x152   :  { %v3445_v35 = vor.u32 %v3789_v34, %v3444_v33  ;;  %v3784_v33 = vld [vmem:[#allocation14 + $0xac] sm:$0xf0] }
 0x153   :  { %v1822_v60 = vadd.f32 %v1821_v44, %v1809_v57  ;;  %v3786_v44 = vld [vmem:[#allocation14 + $0xc4] sm:$0xf]  ;;  %v3501_v57 = vor.u32 %v3802_v55, %v3500_v54 }
 0x154   :  { %v3449_v39 = vor.u32 %v3786_v44, %v3446_v36  ;;  %2301 = vmatpush.bf16.msrb.mxu0 %v3445_v35  ;;  %v3781_v35 = vld [vmem:[#allocation14 + $0x9c] sm:$0xf]  ;;  %v3430_v36 = vld [vmem:[#allocation14 + $0xb0] sm:$0xf0] }
 0x155   :  { %2325 = vmatpush.bf16.msrb.mxu2 %v3501_v57 }
 0x156   :  { %2314 = vmatpush.bf16.msrb.mxu1 %v3449_v39  ;;  %v3806_v39 = vld [vmem:[#allocation14 + $0x164] sm:$0xf] }
 0x158   :  { %v1810_v40 = vpop.f32.mrf.mxu2  ;;  %v1823_v47 = vpop.f32.mrf.mxu3  ;;  %2302 = vmatpush.bf16.msrb.mxu0 %v3421_v52  ;;  %v3508_v52 = vld [vmem:[#allocation14 + $0x130] sm:$0xf] }
 0x159   :  { %v3805_v40 = vld [vmem:[#allocation14 + $0x15c] sm:$0xf]  ;;  %v3509_v57 = vor.u32 %v3803_v53, %v3508_v52  ;;  %v3366_v52 = vld [vmem:[#allocation14 + $0x28] sm:$0xf0] }
 0x15a   :  { %v3529_v47 = vor.u32 %v3805_v40, %v3526_v41  ;;  %2315 = vmatpush.bf16.msrb.mxu1 %v3425_v56  ;;  %v3537_v41 = vor.u32 %v3806_v39, %v3534_v23  ;;  %v3388_v23 = vld [vmem:[#allocation14 + $0x40] sm:$0xf] }
 0x15c   :  { %2337 = vmatpush.bf16.msrb.mxu3 %v3529_v47  ;;  %v3775_v47 = vld [vmem:[#allocation14 + $0x6c] sm:$0xf] }
 0x15d   :  { %v3409_v56 = vor.u32 %v3775_v47, %v3406_v51  ;;  %v3764_v51 = vld [vmem:[#allocation14 + $0x14] sm:$0xf] }
 0x15e   :  { %2316 = vmatpush.bf16.msrb.mxu1 %v3401_v4 }
 0x162   :  { %2317 = vmatpush.bf16.msrb.mxu1 %v3377_v15 }
 0x167   :  { %v1834_v61 = vpop.f32.mrf.mxu0  ;;  %v4239_v24 = vpop.f32.mrf.mxu1 }
 0x168   :  { %v1835_v3 = vadd.f32 %v1834_v61, %v1822_v60  ;;  %v3505_v60 = vor.u32 %v3799_v58, %v3502_v59  ;;  %v1848_v6 = vadd.f32 %v4239_v24, %v424_v42  ;;  %v3396_v61 = vld [vmem:[#allocation14 + $0x60] sm:$0xf]  ;;  %v3372_v24 = vld [vmem:[#allocation14 + $0x30] sm:$0xf]  ;;  %v3404_v42 = vld [vmem:[#allocation14 + $0x68] sm:$0xf] }
 0x169   :  { %v3397_v0 = vor.u32 %v3777_v62, %v3396_v61  ;;  %v3373_v10 = vor.u32 %v3771_v8, %v3372_v24  ;;  %v3405_v50 = vor.u32 %v3778_v46, %v3404_v42  ;;  %v3800_v58 = vld [vmem:[#allocation14 + $0x134] sm:$0xf]  ;;  %v3510_v59 = vld [vmem:[#allocation14 + $0x148] sm:$0xf0]  ;;  %v3486_v24 = vld [vmem:[#allocation14 + $0x118] sm:$0xf0] }
 0x16a   :  { %3832 = vtanh.f32 %v1835_v3  ;;  %2338 = vmatpush.bf16.msrb.mxu3 %v3505_v60  ;;  %v3796_v3 = vld [vmem:[#allocation14 + $0x10c] sm:$0xf0]  ;;  %v3380_v60 = vld [vmem:[#allocation14 + $0x38] sm:$0xf]  ;;  %v3513_v63 = vor.u32 %v3800_v58, %v3510_v59  ;;  %v3356_v8 = vld [vmem:[#allocation14 + $0x8] sm:$0xf] }
 0x16b   :  { %v3477_v5 = vor.u32 %v3796_v3, %v3476_v2  ;;  %2303 = vmatpush.bf16.msrb.mxu0 %v3397_v0  ;;  %v3772_v0 = vld [vmem:[#allocation14 + $0x4c] sm:$0xf0]  ;;  %v3382_v2 = vld [vmem:[#allocation14 + $0x50] sm:$0xf0]  ;;  %v3390_v42 = vld [vmem:[#allocation14 + $0x58] sm:$0xf0] }
 0x16c   :  { %v3381_v3 = vor.u32 %v3772_v0, %v3380_v60  ;;  %v3385_v4 = vor.u32 %v3769_v1, %v3382_v2 }
 0x16d   :  { %2326 = vmatpush.bf16.msrb.mxu2 %v3477_v5  ;;  %v3484_v5 = vld [vmem:[#allocation14 + $0x100] sm:$0xf] }
 0x16e   :  { %2339 = vmatpush.bf16.msrb.mxu3 %v3481_v25 }
 0x16f   :  { %v1836_v17 = vpop.f32.mrf.mxu0  ;;  %v1849_v20 = vpop.f32.mrf.mxu1  ;;  %2304 = vmatpush.bf16.msrb.mxu0 %v3373_v10  ;;  %v3489_v10 = vor.u32 %v3794_v43, %v3486_v24 }
 0x170   :  { %v4247_v12 = vpop.f32.mrf.mxu2  ;;  %v4249_v16 = vpop.f32.mrf.mxu3  ;;  %v3453_v17 = vor.u32 %v3790_v14, %v3452_v13  ;;  %v3358_v13 = vld [vmem:[#allocation14 + $0x20] sm:$0xf0]  ;;  %v3460_v14 = vld [vmem:[#allocation14 + $0xd0] sm:$0xf] }
 0x171   :  { %v3833_v18 = vpop.eup %3832  ;;  %v1861_v48 = vadd.f32 %v4247_v12, %v1848_v6 }
 0x172   :  { %v1989_v28 = vmul.f32 %v3833_v18, %v1946_v19  ;;  %v3787_v18 = vld [vmem:[#allocation14 + $0xcc] sm:$0xf]  ;;  %v3454_v19 = vld [vmem:[#allocation14 + $0xe0] sm:$0xf0]  ;;  %2327 = vmatpush.bf16.msrb.mxu2 %v3453_v17  ;;  %v3791_v17 = vld [vmem:[#allocation14 + $0xe4] sm:$0xf0] }
 0x173   :  { %v3457_v20 = vor.u32 %v3787_v18, %v3454_v19  ;;  %v1874_v21 = vadd.f32 %v4249_v16, %v1861_v48  ;;  %v3433_v16 = vor.u32 %v3781_v35, %v3430_v36  ;;  %v3485_v48 = vor.u32 %v3797_v7, %v3484_v5  ;;  %v3788_v18 = vld [vmem:[#allocation14 + $0xd4] sm:$0xf]  ;;  %v3414_v36 = vld [vmem:[#allocation14 + $0x88] sm:$0xf0] }
 0x174   :  { %v4251_v32 = vadd.f32 %v1989_v28, %v1988_v27  ;;  %v3765_v27 = vld [vmem:[#allocation14 + $0x14] sm:$0xf0]  ;;  %v3762_v28 = vld [vmem:[#allocation14 + $0x4] sm:$0xf]  ;;  %v3357_v19 = vor.u32 %v3766_v9, %v3356_v8  ;;  %v3776_v35 = vld [vmem:[#allocation14 + $0x74] sm:$0xf] }
 0x175   :  { %2340 = vmatpush.bf16.msrb.mxu3 %v3457_v20  ;;  %v3349_v29 = vor.u32 %v3765_v27, %v3348_v26  ;;  %v3353_v44 = vor.u32 %v3762_v28, %v3350_v30  ;;  %v3361_v20 = vor.u32 %v3763_v11, %v3358_v13  ;;  %v3436_v26 = vld [vmem:[#allocation14 + $0xa0] sm:$0xf]  ;;  %v3782_v30 = vld [vmem:[#allocation14 + $0xa4] sm:$0xf]  ;;  %v3417_v39 = vor.u32 %v3776_v35, %v3414_v36 }
 0x176   :  { %1993 = vst [vmem:[#allocation18] sm:$0x3] %v4251_v32 }
 0x177   :  { %2305 = vmatpush.bf16.msrb.mxu0 %v3349_v29  ;;  %2318 = vmatpush.bf16.msrb.mxu1 %v3353_v44  ;;  %v3785_v29 = vld [vmem:[#allocation14 + $0xb4] sm:$0xf0]  ;;  %v3412_v44 = vld [vmem:[#allocation14 + $0x70] sm:$0xf] }
 0x178   :  { %v1862_v45 = vpop.f32.mrf.mxu2  ;;  %v1875_v38 = vpop.f32.mrf.mxu3 }
 0x179   :  { %v3429_v45 = vor.u32 %v3784_v33, %v3428_v31  ;;  %v3809_v38 = vld [vmem:[#allocation14 + $0x174] sm:$0xf0]  ;;  %2341 = vmatpush.bf16.msrb.mxu3 %v3433_v16  ;;  %v3438_v31 = vld [vmem:[#allocation14 + $0xb8] sm:$0xf0]  ;;  %v3437_v33 = vor.u32 %v3785_v29, %v3436_v26 }
 0x17a   :  { %v3533_v40 = vor.u32 %v3809_v38, %v3532_v37 }
 0x17b   :  { %2328 = vmatpush.bf16.msrb.mxu2 %v3429_v45  ;;  %2363 = vmatpush.bf16.msra.mxu1 %v3537_v41  ;;  %v3779_v45 = vld [vmem:[#allocation14 + $0x84] sm:$0xf0]  ;;  %v3770_v41 = vld [vmem:[#allocation14 + $0x44] sm:$0xf] }
 0x17c   :  { %2350 = vmatpush.bf16.msra.mxu0 %v3533_v40  ;;  %v3413_v38 = vor.u32 %v3779_v45, %v3412_v44  ;;  %v3773_v40 = vld [vmem:[#allocation14 + $0x54] sm:$0xf0]  ;;  %v3393_v47 = vor.u32 %v3770_v41, %v3390_v42 }
 0x17d   :  { %2342 = vmatpush.bf16.msrb.mxu3 %v3409_v56  ;;  %v3389_v46 = vor.u32 %v3773_v40, %v3388_v23  ;;  %v3369_v56 = vor.u32 %v3764_v51, %v3366_v52 }
 0x17f   :  { %2329 = vmatpush.bf16.msrb.mxu2 %v3405_v50  ;;  %2364 = vmatpush.bf16.msra.mxu1 %v3513_v63  ;;  %v3767_v50 = vld [vmem:[#allocation14 + $0x24] sm:$0xf0] }
 0x180   :  { %2351 = vmatpush.bf16.msra.mxu0 %v3509_v57 }
 0x181   :  { %2343 = vmatpush.bf16.msrb.mxu3 %v3385_v4 }
 0x183   :  { %2330 = vmatpush.bf16.msrb.mxu2 %v3381_v3  ;;  %2365 = vmatpush.bf16.msra.mxu1 %v3489_v10 }
 0x184   :  { %2352 = vmatpush.bf16.msra.mxu0 %v3485_v48 }
 0x185   :  { %2344 = vmatpush.bf16.msrb.mxu3 %v3361_v20 }
 0x187   :  { %v1886_v22 = vpop.f32.mrf.mxu0  ;;  %v1899_v12 = vpop.f32.mrf.mxu1  ;;  %2331 = vmatpush.bf16.msrb.mxu2 %v3357_v19 }
 0x188   :  { %v1887_v34 = vadd.f32 %v1886_v22, %v1874_v21  ;;  %v3462_v21 = vld [vmem:[#allocation14 + $0xe8] sm:$0xf0]  ;;  %v3461_v22 = vor.u32 %v3791_v17, %v3460_v14 }
 0x18a   :  { %v1900_v49 = vadd.f32 %v1899_v12, %v1887_v34  ;;  %v3465_v12 = vor.u32 %v3788_v18, %v3462_v21  ;;  %2353 = vmatpush.bf16.msra.mxu0 %v3461_v22  ;;  %v3441_v34 = vor.u32 %v3782_v30, %v3438_v31 }
 0x18c   :  { %2366 = vmatpush.bf16.msra.mxu1 %v3465_v12 }
 0x18e   :  { %v1912_v54 = vpop.f32.mrf.mxu2  ;;  %v1925_v55 = vpop.f32.mrf.mxu3  ;;  %2354 = vmatpush.bf16.msra.mxu0 %v3437_v33 }
 0x18f   :  { %v1913_v6 = vadd.f32 %v1912_v54, %v1900_v49  ;;  %v1888_v61 = vpop.f32.mrf.mxu0  ;;  %v1901_v62 = vpop.f32.mrf.mxu1  ;;  %v3364_v49 = vld [vmem:[#allocation14 + $0x10] sm:$0xf] }
 0x190   :  { %2367 = vmatpush.bf16.msra.mxu1 %v3441_v34 }
 0x191   :  { %v1926_v25 = vadd.f32 %v1925_v55, %v1913_v6  ;;  %v3365_v55 = vor.u32 %v3767_v50, %v3364_v49 }
 0x192   :  { %2355 = vmatpush.bf16.msra.mxu0 %v3413_v38 }
 0x193   :  { %v3345_v15 = vmul.f32 -1.442695, %v1926_v25 }
 0x194   :  { %2368 = vmatpush.bf16.msra.mxu1 %v3417_v39 }
 0x195   :  { %3834 = vpow2.f32 %v3345_v15 }
 0x196   :  { %v1914_v27 = vpop.f32.mrf.mxu2  ;;  %v1927_v28 = vpop.f32.mrf.mxu3  ;;  %2356 = vmatpush.bf16.msra.mxu0 %v3389_v46 }
 0x198   :  { %2369 = vmatpush.bf16.msra.mxu1 %v3393_v47 }
 0x19a   :  { %2357 = vmatpush.bf16.msra.mxu0 %v3365_v55 }
 0x19b   :  { %v3835_v37 = vpop.eup %3834 }
 0x19c   :  { %v1971_v16 = vadd.f32 1.0, %v3835_v37  ;;  %2370 = vmatpush.bf16.msra.mxu1 %v3369_v56 }
 0x19e   :  { %3836 = vrcp.f32 %v1971_v16  ;;  %v1983_v58 = vand.u32 2147483648, %v1971_v16  ;;  %v1981_v60 = vand.u32 2147483647, %v1971_v16  ;;  %vm1977_vm14 = vweird.f32 %v1971_v16 }
 0x19f   :  { %3838 = vtanh.f32 %v4251_v32  ;;  %v2044_v32 = vld [vmem:[%s4280_s7] sm:$0x3f]  ;;  %s4112_s7 = smov [#allocation15]  }
 0x1a0   :  { %v1984_v61 = vor.u32 1.1754944e-38, %v1983_v58  ;;  %vm1982_vm0 = vcmp.eq.f32.partialorder %v1981_v60, 8.507059e+37  ;;  %v2047_v4 = vperm.slane %v2044_v32, 1  ;;  %v2048_v43 = vperm.slane %v2044_v32, 2  ;;  %s2401_s9 = sshll.u32 %s4112_s7, 4  ;;  %s2402_s9 = int_to_ptr.vmem [resolvable:$true] %s2401_s9 }
 0x1a1   :  { %v2049_v25 = vperm.slane %v2044_v32, 3  ;;  %v2046_v48 = vperm.slane %v2044_v32, 0  ;;  %v2051_v21 = vperm.slane %v2044_v32, 5  ;;  %v2050_v27 = vperm.slane %v2044_v32, 4 }
 0x1a4   :  { %v3837_v53 = vpop.eup %3836 }
 0x1a5   :  { %v1973_v54 = vmul.f32 %v3837_v53, %v1971_v16  ;;  %vm1978_vm13 = vweird.f32 %v3837_v53  ;;  %v3839_v63 = vpop.eup %3838 }
 0x1a6   :  { %vm1979_vm15 = vmor %vm1977_vm14, %vm1978_vm13 }
 0x1a7   :  { %v1974_v57 = vsub.f32 1.0, %v1973_v54 }
 0x1a9   :  { %v1975_v59 = vmul.f32 %v3837_v53, %v1974_v57 }
 0x1ab   :  { %v1976_v6 = vadd.f32 %v3837_v53, %v1975_v59 }
 0x1ad   :  { %v1980_v62 = vsel %vm1979_vm15, %v3837_v53, %v1976_v6 }
 0x1ae   :  { %v1985_v0 = vsel %vm1982_vm0, %v1984_v61, %v1980_v62 }
 0x1af   :  { %v1992_v1 = vmul.f32 %v3839_v63, %v1985_v0 }
 0x1b1   :  { %v1995_v2 = vpack.c.bf16 %v1992_v1, %v1992_v1  ;;  %1994 = vst [vmem:[#allocation16] sm:$0x3] %v1992_v1 }
 0x1b2   :  { %2417 = dma.vmem_to_hbm [thread:$0]  %s2413_s28, 32, %s2415_s26, [#allocation17]  }
 0x1b3   :  { %2306 = vmatmul.bf16.vlgmr.msrb.gmra.mxu0 %v1995_v2  ;;  %2319 = vmatmul.bf16.vlgmr.msrb.gmra.mxu1 %v1995_v2  ;;  %2428 = dma.vmem_to_hbm [thread:$0]  %s2424_s12, 32, %s2426_s30, [#allocation17]  }
 0x1b4   :  { %2332 = vmatmul.bf16.vlgmr.msrb.gmra.mxu2 %v1995_v2  ;;  %2345 = vmatmul.bf16.vlgmr.msrb.gmra.mxu3 %v1995_v2 }
 0x1c3   :  { %2358 = vmatmul.bf16.vlgmr.msra.gmra.mxu0 %v1995_v2  ;;  %2371 = vmatmul.bf16.vlgmr.msra.gmra.mxu1 %v1995_v2 }
 0x230   :  { %v2307_v3 = vpop.f32.mrf.mxu0  ;;  %v2320_v5 = vpop.f32.mrf.mxu1 }
 0x231   :  { %v2321_v7 = vadd.f32 %v2320_v5, %v2047_v4  ;;  %v2308_v15 = vadd.f32 %v2307_v3, %v2046_v48 }
 0x233   :  { %v2382_v9 = vrot.slane %v2321_v7, 6 }
 0x235   :  { %v2386_v19 = vsel %vm175_vm1, %v2308_v15, %v2382_v9 }
 0x237   :  { %v2333_v24 = vpop.f32.mrf.mxu2  ;;  %v2346_v8 = vpop.f32.mrf.mxu3 }
 0x238   :  { %v2334_v10 = vadd.f32 %v2333_v24, %v2048_v43  ;;  %v2347_v11 = vadd.f32 %v2346_v8, %v2049_v25  ;;  %v2309_v13 = vpop.f32.mrf.mxu0  ;;  %v2322_v14 = vpop.f32.mrf.mxu1 }
 0x23a   :  { %v2383_v17 = vrot.slane %v2334_v10, 4  ;;  %v2384_v18 = vrot.slane %v2347_v11, 2 }
 0x23c   :  { %v2388_v20 = vsel %vm2387_vm2, %v2383_v17, %v2384_v18 }
 0x23d   :  { %v2390_v22 = vsel %vm2389_vm3, %v2386_v19, %v2388_v20 }
 0x23e   :  { %2394 = vst [vmem:[#allocation15] sm:$0xff] %v2390_v22 }
 0x23f   :  { %v2335_v12 = vpop.f32.mrf.mxu2  ;;  %v2348_v26 = vpop.f32.mrf.mxu3 }
 0x240   :  { %v2359_v28 = vpop.f32.mrf.mxu0  ;;  %v2372_v29 = vpop.f32.mrf.mxu1 }
 0x241   :  { %v2373_v30 = vadd.f32 %v2372_v29, %v2051_v21  ;;  %v2360_v31 = vadd.f32 %v2359_v28, %v2050_v27 }
 0x243   :  { %v2385_v33 = vrot.slane %v2373_v30, 6 }
 0x245   :  { %v2391_v34 = vsel %vm175_vm1, %v2360_v31, %v2385_v33 }
 0x246   :  { %2395 = vst [vmem:[#allocation15 + $0x8] sm:$0xf] %v2391_v34 }
 0x247   :  { %2406 = dma.vmem_to_hbm [thread:$0]  %s2402_s9, 192, %s2404_s15, [#allocation5]  }
 0x248   :  { %v2361_v44 = vpop.f32.mrf.mxu0  ;;  %v2374_v45 = vpop.f32.mrf.mxu1 }
 0x249   :  { %4095 = dma.done.wait [#allocation5], 192  }
 0x24a   :  { %4096 = vsyncadd [#allocation5], 4294967104 }
 0x24b   :  { %4097 = dma.done.wait [#allocation17], 64  }
 0x24c   :  { %4098 = vsyncadd [#allocation17], 4294967232 }
 0x24d   :  { %2441 = vsyncpa [#allocation4], 1 }
 0x24e   :  { %2442 = vsyncpa [#allocation7], 1 }
 0x24f   :  { %2443 = vsyncpa [#allocation10], 1 }
 0x250   :  { %2444 = vsyncpa [#allocation13], 1 }
 0x251   :  { %2445 = vsyncpa [#allocation5], 1 }
 0x252   :  { %2446 = vsyncpa [#allocation17], 1 }

</bundles_post_ra>
